<compile_context>
chip_gen: v7x
topology: tpu7x:2x2x1
jax: 0.10.0
libtpu: 0.0.40
codegen_flags: <defaults>
</compile_context>

<pallas_src>
import functools
import math

import jax
import jax.numpy as jnp
from jax.experimental import pallas as pl
from jax.experimental.pallas import tpu as pltpu

BN_EPS = 1e-5
# PyG GINConv default (train_eps=False, eps=0) -> (1 + eps) * x == x, so the
# multiply is elided inside the kernel.


# ---------------------------------------------------------------------------
# Fused Pallas kernel: whole forward pass in one invocation
# ---------------------------------------------------------------------------
def _gin_forward_kernel(
    x_ref,      # [N_pad, F_pad]      bf16 node features (zero-padded)
    a_ref,      # [N_pad, N_pad]      bf16 dense adjacency (dst-major)
    p_ref,      # [G_pad, N_pad]      f32 mean-pool matrix (zero padded rows/cols)
    mask_ref,   # [N_pad, 1]          f32 row mask (1 for true nodes, else 0)
    w0_ref,     # [F_pad, H_pad]      bf16 transform Linear weight (pre-transposed)
    b0_ref,     # [1, H_pad]          f32 transform Linear bias
    g0_ref,     # [1, H_pad]          f32 transform BN gamma (0 in padded cols)
    be0_ref,    # [1, H_pad]          f32 transform BN beta
    w1_ref,     # [L, H_pad, H_pad]   bf16 per-layer first MLP weight
    w2_ref,     # [L, H_pad, H_pad]   bf16 per-layer second MLP weight
    gam_ref,    # [L, 1, H_pad]       f32 per-layer BN gamma
    bet_ref,    # [L, 1, H_pad]       f32 per-layer BN beta
    embed_ref,  # [L+1, G_pad, H_pad] out: graph embeddings
    std_ref,    # [L+1, G_pad, H_pad] out: per-graph std
    *,
    inv_n,      # static Python float: 1 / true node count
    nlayer,     # static Python int
):
    mask = mask_ref[...]
    p = p_ref[...]
    a = a_ref[...]

    def batchnorm(z, gamma, beta):
        # Training-mode BatchNorm1d (biased batch stats), single-pass variance
        # over the *true* nodes only; padded rows re-zeroed afterwards so they
        # never pollute later-layer statistics.
        zm = z * mask
        mean = jnp.sum(zm, axis=0, keepdims=True) * inv_n
        ex2 = jnp.sum(zm * zm, axis=0, keepdims=True) * inv_n
        var = jnp.maximum(ex2 - mean * mean, 0.0)  # cancellation guard
        return (gamma * (zm - mean) * jax.lax.rsqrt(var + BN_EPS) + beta) * mask

    def pool_write(h, li):
        # embed = global_mean_pool(h, batch)
        # std   = sqrt(E_g[h^2] - embed^2)   (single pass, no scatter matmul)
        embed = jnp.dot(p, h, preferred_element_type=jnp.float32)
        msq = jnp.dot(p, h * h, preferred_element_type=jnp.float32)
        std_ref[li] = jnp.sqrt(jnp.maximum(msq - embed * embed, 0.0))
        embed_ref[li] = embed

    # transform = Linear(nfeat, nhid) -> BatchNorm1d(nhid)
    y = jnp.dot(x_ref[...], w0_ref[...], preferred_element_type=jnp.float32)
    h = batchnorm(y + b0_ref[...], g0_ref[...], be0_ref[...])
    pool_write(h, 0)

    # TODO(synk): for large nlayer / large N switch to lax.fori_loop with
    # dynamic w1_ref[li] indexing to bound per-layer live ranges (negligible at
    # nlayer=2, which is why the static unroll is kept here).
    for li in range(nlayer):
        # TODO(synk): dropout is identity (module default dropout=0 / eval).
        # (1 + eps) * h elided: eps == 0 known at trace time (train_eps=False).
        agg = h + jnp.dot(
            a, h.astype(jnp.bfloat16), preferred_element_type=jnp.float32
        )
        t = jnp.maximum(
            jnp.dot(agg.astype(jnp.bfloat16), w1_ref[li],
                    preferred_element_type=jnp.float32),
            0.0,
        )
        z = jnp.maximum(
            jnp.dot(t.astype(jnp.bfloat16), w2_ref[li],
                    preferred_element_type=jnp.float32),
            0.0,
        )  # GINConv MLP (Lin -> ReLU -> Lin, bias=False), then self.act
        h = batchnorm(z, gam_ref[li], bet_ref[li])
        pool_write(h, li + 1)


# ---------------------------------------------------------------------------
# Wrapper: pad to TPU-friendly shapes and launch a single pallas_call
# ---------------------------------------------------------------------------
def _full_spec(shape):
    return pl.BlockSpec(shape, lambda i, _n=len(shape): (0,) * _n)


def _round_up(x, m):
    return ((x + m - 1) // m) * m


def _pad_to(arr, shape):
    pads = [(0, t - s) for s, t in zip(arr.shape, shape)]
    return jnp.pad(arr, pads)


def _nbytes(shape, dtype):
    return int(math.prod(shape)) * jnp.dtype(dtype).itemsize


@functools.partial(jax.jit, static_argnames=("nlayer",))
def gin_forward(x, a, p, params, nlayer):
    n, nfeat = x.shape
    g = p.shape[0]
    nhid = params["w0"].shape[1]

    f_pad = _round_up(nfeat, 128)
    h_pad = _round_up(nhid, 128)
    g_pad = _round_up(g, 8)
    # Node dim padded to 128: sublane-dense [N,H] activations and 128-aligned
    # lane dim for A.  Padded rows are kept at zero via the in-kernel row mask.
    n_pad = _round_up(n, 128)

    bf16 = jnp.bfloat16
    x_p = _pad_to(x, (n_pad, f_pad)).astype(bf16)
    a_p = _pad_to(a, (n_pad, n_pad)).astype(bf16)   # small int counts: exact in bf16
    p_p = _pad_to(p, (g_pad, n_pad))                # pooling stays f32
    mask = _pad_to(jnp.ones((n, 1), jnp.float32), (n_pad, 1))
    w0 = _pad_to(params["w0"], (f_pad, h_pad)).astype(bf16)
    b0 = _pad_to(params["b0"], (1, h_pad))
    g0 = _pad_to(params["g0"], (1, h_pad))
    be0 = _pad_to(params["be0"], (1, h_pad))
    w1 = _pad_to(
        jnp.stack([l["w1"] for l in params["layers"]]), (nlayer, h_pad, h_pad)
    ).astype(bf16)
    w2 = _pad_to(
        jnp.stack([l["w2"] for l in params["layers"]]), (nlayer, h_pad, h_pad)
    ).astype(bf16)
    gam = _pad_to(jnp.stack([l["gamma"] for l in params["layers"]]), (nlayer, 1, h_pad))
    bet = _pad_to(jnp.stack([l["beta"] for l in params["layers"]]), (nlayer, 1, h_pad))

    inputs = (x_p, a_p, p_p, mask, w0, b0, g0, be0, w1, w2, gam, bet)
    out_struct = jax.ShapeDtypeStruct((nlayer + 1, g_pad, h_pad), jnp.float32)

    # VMEM budget: actual resident set (A dominates at scale) + activation
    # working set, x2 headroom, clamped to safe per-generation bounds.
    in_bytes = sum(_nbytes(v.shape, v.dtype) for v in inputs)
    out_bytes = 2 * _nbytes(out_struct.shape, out_struct.dtype)
    act_bytes = 6 * n_pad * h_pad * 4  # h / agg / t / z (+ slack), f32
    vmem_limit = int(
        min(max(2 * (in_bytes + out_bytes + act_bytes) + (8 << 20), 32 << 20), 64 << 20)
    )

    # Advisory cost estimate so XLA schedules the pad/stack glue and output
    # slices around the (otherwise opaque) kernel.
    flops = (
        2 * n_pad * f_pad * h_pad
        + nlayer * (2 * n_pad * n_pad * h_pad + 4 * n_pad * h_pad * h_pad)
        + (nlayer + 1) * 4 * g_pad * n_pad * h_pad
    )
    cost = pl.CostEstimate(
        flops=int(flops),
        transcendentals=int((nlayer + 1) * (h_pad + g_pad * h_pad)),
        bytes_accessed=int(in_bytes + out_bytes),
    )

    kernel = functools.partial(_gin_forward_kernel, inv_n=1.0 / n, nlayer=nlayer)

    embeds, stds = pl.pallas_call(
        kernel,
        out_shape=(out_struct, out_struct),
        grid=(1,),
        in_specs=[_full_spec(v.shape) for v in inputs],
        out_specs=(_full_spec(out_struct.shape), _full_spec(out_struct.shape)),
        compiler_params=pltpu.CompilerParams(
            dimension_semantics=("arbitrary",),
            vmem_limit_bytes=vmem_limit,
        ),
        cost_estimate=cost,
    )(*inputs)

    # Strip lane/sublane padding outside the kernel.
    return embeds[:, :g, :nhid], stds[:, :g, :nhid]


# ---------------------------------------------------------------------------
# Parameters + graph densification (plain-JAX glue)
# ---------------------------------------------------------------------------
def init_params(key, nfeat, nhid, nlayer):
    keys = jax.random.split(key, 2 + 2 * nlayer)
    bound0 = 1.0 / jnp.sqrt(nfeat)
    params = {
        # Linear(nfeat, nhid) stored pre-transposed as (nfeat, nhid)
        "w0": jax.random.uniform(keys[0], (nfeat, nhid), jnp.float32, -bound0, bound0),
        "b0": jax.random.uniform(keys[1], (1, nhid), jnp.float32, -bound0, bound0),
        "g0": jnp.ones((1, nhid), jnp.float32),
        "be0": jnp.zeros((1, nhid), jnp.float32),
        "layers": [],
    }
    bound = 1.0 / jnp.sqrt(nhid)
    for i in range(nlayer):
        params["layers"].append(
            {
                "w1": jax.random.uniform(
                    keys[2 + 2 * i], (nhid, nhid), jnp.float32, -bound, bound
                ),
                "w2": jax.random.uniform(
                    keys[3 + 2 * i], (nhid, nhid), jnp.float32, -bound, bound
                ),
                "gamma": jnp.ones((1, nhid), jnp.float32),
                "beta": jnp.zeros((1, nhid), jnp.float32),
            }
        )
    return params


def build_graph_mats(edge_index, batch, num_nodes, num_graphs):
    src = edge_index[0]
    dst = edge_index[1]
    a = jnp.zeros((num_nodes, num_nodes), jnp.float32).at[dst, src].add(1.0)
    one_hot = jnp.eye(num_graphs, dtype=jnp.float32)[batch]  # (N, G)
    counts = jnp.sum(one_hot, axis=0)                        # (G,)
    p = (one_hot / jnp.maximum(counts, 1.0)[None, :]).T      # (G, N) mean pool
    return a, p


# ---------------------------------------------------------------------------
# Main
# ---------------------------------------------------------------------------
if __name__ == "__main__":
    nfeat, nhid, nlayer = 8, 32, 2
    num_graphs = 2
    nodes_per_graph = 8
    num_nodes = num_graphs * nodes_per_graph  # 16

    key = jax.random.PRNGKey(0)
    kx, kp = jax.random.split(key)

    # Node features
    x = jax.random.normal(kx, (num_nodes, nfeat), jnp.float32)

    # batch vector: first 8 nodes -> graph 0, next 8 -> graph 1
    batch = jnp.concatenate(
        [jnp.full((nodes_per_graph,), g, jnp.int32) for g in range(num_graphs)]
    )

    # edge_index: undirected ring inside each graph (both directions listed)
    src_list, dst_list = [], []
    for g in range(num_graphs):
        base = g * nodes_per_graph
        for i in range(nodes_per_graph):
            u = base + i
            v = base + (i + 1) % nodes_per_graph
            src_list += [u, v]
            dst_list += [v, u]
    edge_index = jnp.array([src_list, dst_list], dtype=jnp.int32)

    a, p = build_graph_mats(edge_index, batch, num_nodes, num_graphs)
    params = init_params(kp, nfeat, nhid, nlayer)

    graph_embeds, graph_stds = gin_forward(x, a, p, params, nlayer)
    jax.block_until_ready((graph_embeds, graph_stds))

    assert graph_embeds.shape == (nlayer + 1, num_graphs, nhid)
    assert graph_stds.shape == (nlayer + 1, num_graphs, nhid)
    assert bool(jnp.all(jnp.isfinite(graph_embeds)))
    assert bool(jnp.all(jnp.isfinite(graph_stds)))
    assert bool(jnp.all(graph_stds >= 0.0))
    print("KERNEL_OK")
</pallas_src>

<mosaic_0001>
module attributes {stable_mosaic.version = 11 : i64} {
  func.func @_gin_forward_kernel(%arg0: i32, %arg1: memref<128x128xbf16, #tpu.memory_space<vmem>>, %arg2: memref<128x128xbf16, #tpu.memory_space<vmem>>, %arg3: memref<8x128xf32, #tpu.memory_space<vmem>>, %arg4: memref<128x1xf32, #tpu.memory_space<vmem>>, %arg5: memref<128x128xbf16, #tpu.memory_space<vmem>>, %arg6: memref<1x128xf32, #tpu.memory_space<vmem>>, %arg7: memref<1x128xf32, #tpu.memory_space<vmem>>, %arg8: memref<1x128xf32, #tpu.memory_space<vmem>>, %arg9: memref<2x128x128xbf16, #tpu.memory_space<vmem>>, %arg10: memref<2x128x128xbf16, #tpu.memory_space<vmem>>, %arg11: memref<2x1x128xf32, #tpu.memory_space<vmem>>, %arg12: memref<2x1x128xf32, #tpu.memory_space<vmem>>, %arg13: memref<3x8x128xf32, #tpu.memory_space<vmem>>, %arg14: memref<3x8x128xf32, #tpu.memory_space<vmem>>) attributes {dimension_semantics = [#tpu.dimension_semantics<arbitrary>], iteration_bounds = array<i64: 1>, scalar_prefetch = 0 : i64, scratch_operands = 0 : i64, tpu.core_type = #tpu.core_type<tc>, window_params = [{pipeline_mode = #tpu.pipeline_mode<synchronous>, transform_indices = @transform_0, window_bounds = array<i64: 128, 128>}, {pipeline_mode = #tpu.pipeline_mode<synchronous>, transform_indices = @transform_1, window_bounds = array<i64: 128, 128>}, {pipeline_mode = #tpu.pipeline_mode<synchronous>, transform_indices = @transform_2, window_bounds = array<i64: 8, 128>}, {pipeline_mode = #tpu.pipeline_mode<synchronous>, transform_indices = @transform_3, window_bounds = array<i64: 128, 1>}, {pipeline_mode = #tpu.pipeline_mode<synchronous>, transform_indices = @transform_4, window_bounds = array<i64: 128, 128>}, {pipeline_mode = #tpu.pipeline_mode<synchronous>, transform_indices = @transform_5, window_bounds = array<i64: 1, 128>}, {pipeline_mode = #tpu.pipeline_mode<synchronous>, transform_indices = @transform_6, window_bounds = array<i64: 1, 128>}, {pipeline_mode = #tpu.pipeline_mode<synchronous>, transform_indices = @transform_7, window_bounds = array<i64: 1, 128>}, {pipeline_mode = #tpu.pipeline_mode<synchronous>, transform_indices = @transform_8, window_bounds = array<i64: 2, 128, 128>}, {pipeline_mode = #tpu.pipeline_mode<synchronous>, transform_indices = @transform_9, window_bounds = array<i64: 2, 128, 128>}, {pipeline_mode = #tpu.pipeline_mode<synchronous>, transform_indices = @transform_10, window_bounds = array<i64: 2, 1, 128>}, {pipeline_mode = #tpu.pipeline_mode<synchronous>, transform_indices = @transform_11, window_bounds = array<i64: 2, 1, 128>}, {pipeline_mode = #tpu.pipeline_mode<synchronous>, transform_indices = @transform_12, window_bounds = array<i64: 3, 8, 128>}, {pipeline_mode = #tpu.pipeline_mode<synchronous>, transform_indices = @transform_13, window_bounds = array<i64: 3, 8, 128>}]} {
    %c0 = arith.constant 0 : index
    %c0_0 = arith.constant 0 : index
    %0 = vector.load %arg4[%c0, %c0_0] : memref<128x1xf32, #tpu.memory_space<vmem>>, vector<128x1xf32>
    %c0_1 = arith.constant 0 : index
    %c0_2 = arith.constant 0 : index
    %1 = vector.load %arg3[%c0_1, %c0_2] : memref<8x128xf32, #tpu.memory_space<vmem>>, vector<8x128xf32>
    %c0_3 = arith.constant 0 : index
    %c0_4 = arith.constant 0 : index
    %2 = vector.load %arg2[%c0_3, %c0_4] : memref<128x128xbf16, #tpu.memory_space<vmem>>, vector<128x128xbf16>
    %c0_5 = arith.constant 0 : index
    %c0_6 = arith.constant 0 : index
    %3 = vector.load %arg1[%c0_5, %c0_6] : memref<128x128xbf16, #tpu.memory_space<vmem>>, vector<128x128xbf16>
    %c0_7 = arith.constant 0 : index
    %c0_8 = arith.constant 0 : index
    %4 = vector.load %arg5[%c0_7, %c0_8] : memref<128x128xbf16, #tpu.memory_space<vmem>>, vector<128x128xbf16>
    %cst = arith.constant dense<0.000000e+00> : vector<128x128xf32>
    %5 = tpu.matmul %3, %4, %cst {dimension_numbers = #tpu.dot_dimension_numbers<[1], [0], [0], [1], [0, 0, 1, 1], [], []>} : vector<128x128xbf16>, vector<128x128xbf16>, vector<128x128xf32> -> vector<128x128xf32>
    %c0_9 = arith.constant 0 : index
    %c0_10 = arith.constant 0 : index
    %6 = vector.load %arg6[%c0_9, %c0_10] : memref<1x128xf32, #tpu.memory_space<vmem>>, vector<1x128xf32>
    %7 = vector.broadcast %6 : vector<1x128xf32> to vector<128x128xf32>
    %8 = arith.addf %5, %7 : vector<128x128xf32>
    %c0_11 = arith.constant 0 : index
    %c0_12 = arith.constant 0 : index
    %9 = vector.load %arg7[%c0_11, %c0_12] : memref<1x128xf32, #tpu.memory_space<vmem>>, vector<1x128xf32>
    %c0_13 = arith.constant 0 : index
    %c0_14 = arith.constant 0 : index
    %10 = vector.load %arg8[%c0_13, %c0_14] : memref<1x128xf32, #tpu.memory_space<vmem>>, vector<1x128xf32>
    %11 = vector.broadcast %0 : vector<128x1xf32> to vector<128x128xf32>
    %12 = arith.mulf %8, %11 : vector<128x128xf32>
    %cst_15 = arith.constant dense<0.000000e+00> : vector<128xf32>
    %13 = vector.multi_reduction <add>, %12, %cst_15 [0] : vector<128x128xf32> to vector<128xf32>
    %14 = vector.shape_cast %13 : vector<128xf32> to vector<1x128xf32>
    %cst_16 = arith.constant 6.250000e-02 : f32
    %15 = vector.broadcast %cst_16 : f32 to vector<1x128xf32>
    %16 = arith.mulf %14, %15 : vector<1x128xf32>
    %17 = arith.mulf %12, %12 : vector<128x128xf32>
    %cst_17 = arith.constant dense<0.000000e+00> : vector<128xf32>
    %18 = vector.multi_reduction <add>, %17, %cst_17 [0] : vector<128x128xf32> to vector<128xf32>
    %19 = vector.shape_cast %18 : vector<128xf32> to vector<1x128xf32>
    %cst_18 = arith.constant 6.250000e-02 : f32
    %20 = vector.broadcast %cst_18 : f32 to vector<1x128xf32>
    %21 = arith.mulf %19, %20 : vector<1x128xf32>
    %22 = arith.mulf %16, %16 : vector<1x128xf32>
    %23 = arith.subf %21, %22 : vector<1x128xf32>
    %cst_19 = arith.constant 0.000000e+00 : f32
    %24 = vector.broadcast %cst_19 : f32 to vector<1x128xf32>
    %25 = arith.maximumf %23, %24 : vector<1x128xf32>
    %26 = vector.broadcast %16 : vector<1x128xf32> to vector<128x128xf32>
    %27 = arith.subf %12, %26 : vector<128x128xf32>
    %28 = vector.broadcast %9 : vector<1x128xf32> to vector<128x128xf32>
    %29 = arith.mulf %28, %27 : vector<128x128xf32>
    %cst_20 = arith.constant 9.99999974E-6 : f32
    %30 = vector.broadcast %cst_20 : f32 to vector<1x128xf32>
    %31 = arith.addf %25, %30 : vector<1x128xf32>
    %32 = math.rsqrt %31 : vector<1x128xf32>
    %33 = vector.broadcast %32 : vector<1x128xf32> to vector<128x128xf32>
    %34 = arith.mulf %29, %33 : vector<128x128xf32>
    %35 = vector.broadcast %10 : vector<1x128xf32> to vector<128x128xf32>
    %36 = arith.addf %34, %35 : vector<128x128xf32>
    %37 = vector.broadcast %0 : vector<128x1xf32> to vector<128x128xf32>
    %38 = arith.mulf %36, %37 : vector<128x128xf32>
    %cst_21 = arith.constant dense<0.000000e+00> : vector<8x128xf32>
    %39 = tpu.matmul %1, %38, %cst_21 {dimension_numbers = #tpu.dot_dimension_numbers<[1], [0], [0], [1], [0, 0, 1, 1], [], []>} : vector<8x128xf32>, vector<128x128xf32>, vector<8x128xf32> -> vector<8x128xf32>
    %40 = arith.mulf %38, %38 : vector<128x128xf32>
    %cst_22 = arith.constant dense<0.000000e+00> : vector<8x128xf32>
    %41 = tpu.matmul %1, %40, %cst_22 {dimension_numbers = #tpu.dot_dimension_numbers<[1], [0], [0], [1], [0, 0, 1, 1], [], []>} : vector<8x128xf32>, vector<128x128xf32>, vector<8x128xf32> -> vector<8x128xf32>
    %42 = arith.mulf %39, %39 : vector<8x128xf32>
    %43 = arith.subf %41, %42 : vector<8x128xf32>
    %cst_23 = arith.constant 0.000000e+00 : f32
    %44 = vector.broadcast %cst_23 : f32 to vector<8x128xf32>
    %45 = arith.maximumf %43, %44 : vector<8x128xf32>
    %46 = math.sqrt %45 : vector<8x128xf32>
    %c0_24 = arith.constant 0 : index
    %c0_25 = arith.constant 0 : index
    %c0_26 = arith.constant 0 : index
    %47 = vector.load %arg14[%c0_24, %c0_25, %c0_26] : memref<3x8x128xf32, #tpu.memory_space<vmem>>, vector<1x8x128xf32>
    %48 = vector.shape_cast %47 : vector<1x8x128xf32> to vector<8x128xf32>
    %49 = vector.shape_cast %46 : vector<8x128xf32> to vector<1x8x128xf32>
    tpu.vector_store %arg14[%c0_24, %c0_25, %c0_26], %49 {strides = array<i32>} : memref<3x8x128xf32, #tpu.memory_space<vmem>>, vector<1x8x128xf32>,
    %c0_27 = arith.constant 0 : index
    %c0_28 = arith.constant 0 : index
    %c0_29 = arith.constant 0 : index
    %50 = vector.load %arg13[%c0_27, %c0_28, %c0_29] : memref<3x8x128xf32, #tpu.memory_space<vmem>>, vector<1x8x128xf32>
    %51 = vector.shape_cast %50 : vector<1x8x128xf32> to vector<8x128xf32>
    %52 = vector.shape_cast %39 : vector<8x128xf32> to vector<1x8x128xf32>
    tpu.vector_store %arg13[%c0_27, %c0_28, %c0_29], %52 {strides = array<i32>} : memref<3x8x128xf32, #tpu.memory_space<vmem>>, vector<1x8x128xf32>,
    %53 = arith.truncf %38 : vector<128x128xf32> to vector<128x128xbf16>
    %cst_30 = arith.constant dense<0.000000e+00> : vector<128x128xf32>
    %54 = tpu.matmul %2, %53, %cst_30 {dimension_numbers = #tpu.dot_dimension_numbers<[1], [0], [0], [1], [0, 0, 1, 1], [], []>} : vector<128x128xbf16>, vector<128x128xbf16>, vector<128x128xf32> -> vector<128x128xf32>
    %55 = arith.addf %38, %54 : vector<128x128xf32>
    %56 = arith.truncf %55 : vector<128x128xf32> to vector<128x128xbf16>
    %c0_31 = arith.constant 0 : index
    %c0_32 = arith.constant 0 : index
    %c0_33 = arith.constant 0 : index
    %57 = vector.load %arg9[%c0_31, %c0_32, %c0_33] : memref<2x128x128xbf16, #tpu.memory_space<vmem>>, vector<1x128x128xbf16>
    %58 = vector.shape_cast %57 : vector<1x128x128xbf16> to vector<128x128xbf16>
    %cst_34 = arith.constant dense<0.000000e+00> : vector<128x128xf32>
    %59 = tpu.matmul %56, %58, %cst_34 {dimension_numbers = #tpu.dot_dimension_numbers<[1], [0], [0], [1], [0, 0, 1, 1], [], []>} : vector<128x128xbf16>, vector<128x128xbf16>, vector<128x128xf32> -> vector<128x128xf32>
    %cst_35 = arith.constant 0.000000e+00 : f32
    %60 = vector.broadcast %cst_35 : f32 to vector<128x128xf32>
    %61 = arith.maximumf %59, %60 : vector<128x128xf32>
    %62 = arith.truncf %61 : vector<128x128xf32> to vector<128x128xbf16>
    %c0_36 = arith.constant 0 : index
    %c0_37 = arith.constant 0 : index
    %c0_38 = arith.constant 0 : index
    %63 = vector.load %arg10[%c0_36, %c0_37, %c0_38] : memref<2x128x128xbf16, #tpu.memory_space<vmem>>, vector<1x128x128xbf16>
    %64 = vector.shape_cast %63 : vector<1x128x128xbf16> to vector<128x128xbf16>
    %cst_39 = arith.constant dense<0.000000e+00> : vector<128x128xf32>
    %65 = tpu.matmul %62, %64, %cst_39 {dimension_numbers = #tpu.dot_dimension_numbers<[1], [0], [0], [1], [0, 0, 1, 1], [], []>} : vector<128x128xbf16>, vector<128x128xbf16>, vector<128x128xf32> -> vector<128x128xf32>
    %cst_40 = arith.constant 0.000000e+00 : f32
    %66 = vector.broadcast %cst_40 : f32 to vector<128x128xf32>
    %67 = arith.maximumf %65, %66 : vector<128x128xf32>
    %c0_41 = arith.constant 0 : index
    %c0_42 = arith.constant 0 : index
    %c0_43 = arith.constant 0 : index
    %68 = vector.load %arg11[%c0_41, %c0_42, %c0_43] : memref<2x1x128xf32, #tpu.memory_space<vmem>>, vector<1x1x128xf32>
    %69 = vector.shape_cast %68 : vector<1x1x128xf32> to vector<1x128xf32>
    %c0_44 = arith.constant 0 : index
    %c0_45 = arith.constant 0 : index
    %c0_46 = arith.constant 0 : index
    %70 = vector.load %arg12[%c0_44, %c0_45, %c0_46] : memref<2x1x128xf32, #tpu.memory_space<vmem>>, vector<1x1x128xf32>
    %71 = vector.shape_cast %70 : vector<1x1x128xf32> to vector<1x128xf32>
    %72 = vector.broadcast %0 : vector<128x1xf32> to vector<128x128xf32>
    %73 = arith.mulf %67, %72 : vector<128x128xf32>
    %cst_47 = arith.constant dense<0.000000e+00> : vector<128xf32>
    %74 = vector.multi_reduction <add>, %73, %cst_47 [0] : vector<128x128xf32> to vector<128xf32>
    %75 = vector.shape_cast %74 : vector<128xf32> to vector<1x128xf32>
    %cst_48 = arith.constant 6.250000e-02 : f32
    %76 = vector.broadcast %cst_48 : f32 to vector<1x128xf32>
    %77 = arith.mulf %75, %76 : vector<1x128xf32>
    %78 = arith.mulf %73, %73 : vector<128x128xf32>
    %cst_49 = arith.constant dense<0.000000e+00> : vector<128xf32>
    %79 = vector.multi_reduction <add>, %78, %cst_49 [0] : vector<128x128xf32> to vector<128xf32>
    %80 = vector.shape_cast %79 : vector<128xf32> to vector<1x128xf32>
    %cst_50 = arith.constant 6.250000e-02 : f32
    %81 = vector.broadcast %cst_50 : f32 to vector<1x128xf32>
    %82 = arith.mulf %80, %81 : vector<1x128xf32>
    %83 = arith.mulf %77, %77 : vector<1x128xf32>
    %84 = arith.subf %82, %83 : vector<1x128xf32>
    %cst_51 = arith.constant 0.000000e+00 : f32
    %85 = vector.broadcast %cst_51 : f32 to vector<1x128xf32>
    %86 = arith.maximumf %84, %85 : vector<1x128xf32>
    %87 = vector.broadcast %77 : vector<1x128xf32> to vector<128x128xf32>
    %88 = arith.subf %73, %87 : vector<128x128xf32>
    %89 = vector.broadcast %69 : vector<1x128xf32> to vector<128x128xf32>
    %90 = arith.mulf %89, %88 : vector<128x128xf32>
    %cst_52 = arith.constant 9.99999974E-6 : f32
    %91 = vector.broadcast %cst_52 : f32 to vector<1x128xf32>
    %92 = arith.addf %86, %91 : vector<1x128xf32>
    %93 = math.rsqrt %92 : vector<1x128xf32>
    %94 = vector.broadcast %93 : vector<1x128xf32> to vector<128x128xf32>
    %95 = arith.mulf %90, %94 : vector<128x128xf32>
    %96 = vector.broadcast %71 : vector<1x128xf32> to vector<128x128xf32>
    %97 = arith.addf %95, %96 : vector<128x128xf32>
    %98 = vector.broadcast %0 : vector<128x1xf32> to vector<128x128xf32>
    %99 = arith.mulf %97, %98 : vector<128x128xf32>
    %cst_53 = arith.constant dense<0.000000e+00> : vector<8x128xf32>
    %100 = tpu.matmul %1, %99, %cst_53 {dimension_numbers = #tpu.dot_dimension_numbers<[1], [0], [0], [1], [0, 0, 1, 1], [], []>} : vector<8x128xf32>, vector<128x128xf32>, vector<8x128xf32> -> vector<8x128xf32>
    %101 = arith.mulf %99, %99 : vector<128x128xf32>
    %cst_54 = arith.constant dense<0.000000e+00> : vector<8x128xf32>
    %102 = tpu.matmul %1, %101, %cst_54 {dimension_numbers = #tpu.dot_dimension_numbers<[1], [0], [0], [1], [0, 0, 1, 1], [], []>} : vector<8x128xf32>, vector<128x128xf32>, vector<8x128xf32> -> vector<8x128xf32>
    %103 = arith.mulf %100, %100 : vector<8x128xf32>
    %104 = arith.subf %102, %103 : vector<8x128xf32>
    %cst_55 = arith.constant 0.000000e+00 : f32
    %105 = vector.broadcast %cst_55 : f32 to vector<8x128xf32>
    %106 = arith.maximumf %104, %105 : vector<8x128xf32>
    %107 = math.sqrt %106 : vector<8x128xf32>
    %c1 = arith.constant 1 : index
    %c0_56 = arith.constant 0 : index
    %c0_57 = arith.constant 0 : index
    %108 = vector.load %arg14[%c1, %c0_56, %c0_57] : memref<3x8x128xf32, #tpu.memory_space<vmem>>, vector<1x8x128xf32>
    %109 = vector.shape_cast %108 : vector<1x8x128xf32> to vector<8x128xf32>
    %110 = vector.shape_cast %107 : vector<8x128xf32> to vector<1x8x128xf32>
    tpu.vector_store %arg14[%c1, %c0_56, %c0_57], %110 {strides = array<i32>} : memref<3x8x128xf32, #tpu.memory_space<vmem>>, vector<1x8x128xf32>,
    %c1_58 = arith.constant 1 : index
    %c0_59 = arith.constant 0 : index
    %c0_60 = arith.constant 0 : index
    %111 = vector.load %arg13[%c1_58, %c0_59, %c0_60] : memref<3x8x128xf32, #tpu.memory_space<vmem>>, vector<1x8x128xf32>
    %112 = vector.shape_cast %111 : vector<1x8x128xf32> to vector<8x128xf32>
    %113 = vector.shape_cast %100 : vector<8x128xf32> to vector<1x8x128xf32>
    tpu.vector_store %arg13[%c1_58, %c0_59, %c0_60], %113 {strides = array<i32>} : memref<3x8x128xf32, #tpu.memory_space<vmem>>, vector<1x8x128xf32>,
    %114 = arith.truncf %99 : vector<128x128xf32> to vector<128x128xbf16>
    %cst_61 = arith.constant dense<0.000000e+00> : vector<128x128xf32>
    %115 = tpu.matmul %2, %114, %cst_61 {dimension_numbers = #tpu.dot_dimension_numbers<[1], [0], [0], [1], [0, 0, 1, 1], [], []>} : vector<128x128xbf16>, vector<128x128xbf16>, vector<128x128xf32> -> vector<128x128xf32>
    %116 = arith.addf %99, %115 : vector<128x128xf32>
    %117 = arith.truncf %116 : vector<128x128xf32> to vector<128x128xbf16>
    %c1_62 = arith.constant 1 : index
    %c0_63 = arith.constant 0 : index
    %c0_64 = arith.constant 0 : index
    %118 = vector.load %arg9[%c1_62, %c0_63, %c0_64] : memref<2x128x128xbf16, #tpu.memory_space<vmem>>, vector<1x128x128xbf16>
    %119 = vector.shape_cast %118 : vector<1x128x128xbf16> to vector<128x128xbf16>
    %cst_65 = arith.constant dense<0.000000e+00> : vector<128x128xf32>
    %120 = tpu.matmul %117, %119, %cst_65 {dimension_numbers = #tpu.dot_dimension_numbers<[1], [0], [0], [1], [0, 0, 1, 1], [], []>} : vector<128x128xbf16>, vector<128x128xbf16>, vector<128x128xf32> -> vector<128x128xf32>
    %cst_66 = arith.constant 0.000000e+00 : f32
    %121 = vector.broadcast %cst_66 : f32 to vector<128x128xf32>
    %122 = arith.maximumf %120, %121 : vector<128x128xf32>
    %123 = arith.truncf %122 : vector<128x128xf32> to vector<128x128xbf16>
    %c1_67 = arith.constant 1 : index
    %c0_68 = arith.constant 0 : index
    %c0_69 = arith.constant 0 : index
    %124 = vector.load %arg10[%c1_67, %c0_68, %c0_69] : memref<2x128x128xbf16, #tpu.memory_space<vmem>>, vector<1x128x128xbf16>
    %125 = vector.shape_cast %124 : vector<1x128x128xbf16> to vector<128x128xbf16>
    %cst_70 = arith.constant dense<0.000000e+00> : vector<128x128xf32>
    %126 = tpu.matmul %123, %125, %cst_70 {dimension_numbers = #tpu.dot_dimension_numbers<[1], [0], [0], [1], [0, 0, 1, 1], [], []>} : vector<128x128xbf16>, vector<128x128xbf16>, vector<128x128xf32> -> vector<128x128xf32>
    %cst_71 = arith.constant 0.000000e+00 : f32
    %127 = vector.broadcast %cst_71 : f32 to vector<128x128xf32>
    %128 = arith.maximumf %126, %127 : vector<128x128xf32>
    %c1_72 = arith.constant 1 : index
    %c0_73 = arith.constant 0 : index
    %c0_74 = arith.constant 0 : index
    %129 = vector.load %arg11[%c1_72, %c0_73, %c0_74] : memref<2x1x128xf32, #tpu.memory_space<vmem>>, vector<1x1x128xf32>
    %130 = vector.shape_cast %129 : vector<1x1x128xf32> to vector<1x128xf32>
    %c1_75 = arith.constant 1 : index
    %c0_76 = arith.constant 0 : index
    %c0_77 = arith.constant 0 : index
    %131 = vector.load %arg12[%c1_75, %c0_76, %c0_77] : memref<2x1x128xf32, #tpu.memory_space<vmem>>, vector<1x1x128xf32>
    %132 = vector.shape_cast %131 : vector<1x1x128xf32> to vector<1x128xf32>
    %133 = vector.broadcast %0 : vector<128x1xf32> to vector<128x128xf32>
    %134 = arith.mulf %128, %133 : vector<128x128xf32>
    %cst_78 = arith.constant dense<0.000000e+00> : vector<128xf32>
    %135 = vector.multi_reduction <add>, %134, %cst_78 [0] : vector<128x128xf32> to vector<128xf32>
    %136 = vector.shape_cast %135 : vector<128xf32> to vector<1x128xf32>
    %cst_79 = arith.constant 6.250000e-02 : f32
    %137 = vector.broadcast %cst_79 : f32 to vector<1x128xf32>
    %138 = arith.mulf %136, %137 : vector<1x128xf32>
    %139 = arith.mulf %134, %134 : vector<128x128xf32>
    %cst_80 = arith.constant dense<0.000000e+00> : vector<128xf32>
    %140 = vector.multi_reduction <add>, %139, %cst_80 [0] : vector<128x128xf32> to vector<128xf32>
    %141 = vector.shape_cast %140 : vector<128xf32> to vector<1x128xf32>
    %cst_81 = arith.constant 6.250000e-02 : f32
    %142 = vector.broadcast %cst_81 : f32 to vector<1x128xf32>
    %143 = arith.mulf %141, %142 : vector<1x128xf32>
    %144 = arith.mulf %138, %138 : vector<1x128xf32>
    %145 = arith.subf %143, %144 : vector<1x128xf32>
    %cst_82 = arith.constant 0.000000e+00 : f32
    %146 = vector.broadcast %cst_82 : f32 to vector<1x128xf32>
    %147 = arith.maximumf %145, %146 : vector<1x128xf32>
    %148 = vector.broadcast %138 : vector<1x128xf32> to vector<128x128xf32>
    %149 = arith.subf %134, %148 : vector<128x128xf32>
    %150 = vector.broadcast %130 : vector<1x128xf32> to vector<128x128xf32>
    %151 = arith.mulf %150, %149 : vector<128x128xf32>
    %cst_83 = arith.constant 9.99999974E-6 : f32
    %152 = vector.broadcast %cst_83 : f32 to vector<1x128xf32>
    %153 = arith.addf %147, %152 : vector<1x128xf32>
    %154 = math.rsqrt %153 : vector<1x128xf32>
    %155 = vector.broadcast %154 : vector<1x128xf32> to vector<128x128xf32>
    %156 = arith.mulf %151, %155 : vector<128x128xf32>
    %157 = vector.broadcast %132 : vector<1x128xf32> to vector<128x128xf32>
    %158 = arith.addf %156, %157 : vector<128x128xf32>
    %159 = vector.broadcast %0 : vector<128x1xf32> to vector<128x128xf32>
    %160 = arith.mulf %158, %159 : vector<128x128xf32>
    %cst_84 = arith.constant dense<0.000000e+00> : vector<8x128xf32>
    %161 = tpu.matmul %1, %160, %cst_84 {dimension_numbers = #tpu.dot_dimension_numbers<[1], [0], [0], [1], [0, 0, 1, 1], [], []>} : vector<8x128xf32>, vector<128x128xf32>, vector<8x128xf32> -> vector<8x128xf32>
    %162 = arith.mulf %160, %160 : vector<128x128xf32>
    %cst_85 = arith.constant dense<0.000000e+00> : vector<8x128xf32>
    %163 = tpu.matmul %1, %162, %cst_85 {dimension_numbers = #tpu.dot_dimension_numbers<[1], [0], [0], [1], [0, 0, 1, 1], [], []>} : vector<8x128xf32>, vector<128x128xf32>, vector<8x128xf32> -> vector<8x128xf32>
    %164 = arith.mulf %161, %161 : vector<8x128xf32>
    %165 = arith.subf %163, %164 : vector<8x128xf32>
    %cst_86 = arith.constant 0.000000e+00 : f32
    %166 = vector.broadcast %cst_86 : f32 to vector<8x128xf32>
    %167 = arith.maximumf %165, %166 : vector<8x128xf32>
    %168 = math.sqrt %167 : vector<8x128xf32>
    %c2 = arith.constant 2 : index
    %c0_87 = arith.constant 0 : index
    %c0_88 = arith.constant 0 : index
    %169 = vector.load %arg14[%c2, %c0_87, %c0_88] : memref<3x8x128xf32, #tpu.memory_space<vmem>>, vector<1x8x128xf32>
    %170 = vector.shape_cast %169 : vector<1x8x128xf32> to vector<8x128xf32>
    %171 = vector.shape_cast %168 : vector<8x128xf32> to vector<1x8x128xf32>
    tpu.vector_store %arg14[%c2, %c0_87, %c0_88], %171 {strides = array<i32>} : memref<3x8x128xf32, #tpu.memory_space<vmem>>, vector<1x8x128xf32>,
    %c2_89 = arith.constant 2 : index
    %c0_90 = arith.constant 0 : index
    %c0_91 = arith.constant 0 : index
    %172 = vector.load %arg13[%c2_89, %c0_90, %c0_91] : memref<3x8x128xf32, #tpu.memory_space<vmem>>, vector<1x8x128xf32>
    %173 = vector.shape_cast %172 : vector<1x8x128xf32> to vector<8x128xf32>
    %174 = vector.shape_cast %161 : vector<8x128xf32> to vector<1x8x128xf32>
    tpu.vector_store %arg13[%c2_89, %c0_90, %c0_91], %174 {strides = array<i32>} : memref<3x8x128xf32, #tpu.memory_space<vmem>>, vector<1x8x128xf32>,
    return
  }
  func.func @transform_0(%arg0: i32) -> (i32, i32) {
    %c0_i32 = arith.constant 0 : i32
    %c0_i32_0 = arith.constant 0 : i32
    %c0_i32_1 = arith.constant 0 : i32
    return %c0_i32, %c0_i32_0 : i32, i32
  }
  func.func @transform_1(%arg0: i32) -> (i32, i32) {
    %c0_i32 = arith.constant 0 : i32
    %c0_i32_0 = arith.constant 0 : i32
    %c0_i32_1 = arith.constant 0 : i32
    return %c0_i32, %c0_i32_0 : i32, i32
  }
  func.func @transform_2(%arg0: i32) -> (i32, i32) {
    %c0_i32 = arith.constant 0 : i32
    %c0_i32_0 = arith.constant 0 : i32
    %c0_i32_1 = arith.constant 0 : i32
    return %c0_i32, %c0_i32_0 : i32, i32
  }
  func.func @transform_3(%arg0: i32) -> (i32, i32) {
    %c0_i32 = arith.constant 0 : i32
    %c0_i32_0 = arith.constant 0 : i32
    %c0_i32_1 = arith.constant 0 : i32
    return %c0_i32, %c0_i32_0 : i32, i32
  }
  func.func @transform_4(%arg0: i32) -> (i32, i32) {
    %c0_i32 = arith.constant 0 : i32
    %c0_i32_0 = arith.constant 0 : i32
    %c0_i32_1 = arith.constant 0 : i32
    return %c0_i32, %c0_i32_0 : i32, i32
  }
  func.func @transform_5(%arg0: i32) -> (i32, i32) {
    %c0_i32 = arith.constant 0 : i32
    %c0_i32_0 = arith.constant 0 : i32
    %c0_i32_1 = arith.constant 0 : i32
    return %c0_i32, %c0_i32_0 : i32, i32
  }
  func.func @transform_6(%arg0: i32) -> (i32, i32) {
    %c0_i32 = arith.constant 0 : i32
    %c0_i32_0 = arith.constant 0 : i32
    %c0_i32_1 = arith.constant 0 : i32
    return %c0_i32, %c0_i32_0 : i32, i32
  }
  func.func @transform_7(%arg0: i32) -> (i32, i32) {
    %c0_i32 = arith.constant 0 : i32
    %c0_i32_0 = arith.constant 0 : i32
    %c0_i32_1 = arith.constant 0 : i32
    return %c0_i32, %c0_i32_0 : i32, i32
  }
  func.func @transform_8(%arg0: i32) -> (i32, i32, i32) {
    %c0_i32 = arith.constant 0 : i32
    %c0_i32_0 = arith.constant 0 : i32
    %c0_i32_1 = arith.constant 0 : i32
    %c0_i32_2 = arith.constant 0 : i32
    return %c0_i32, %c0_i32_0, %c0_i32_1 : i32, i32, i32
  }
  func.func @transform_9(%arg0: i32) -> (i32, i32, i32) {
    %c0_i32 = arith.constant 0 : i32
    %c0_i32_0 = arith.constant 0 : i32
    %c0_i32_1 = arith.constant 0 : i32
    %c0_i32_2 = arith.constant 0 : i32
    return %c0_i32, %c0_i32_0, %c0_i32_1 : i32, i32, i32
  }
  func.func @transform_10(%arg0: i32) -> (i32, i32, i32) {
    %c0_i32 = arith.constant 0 : i32
    %c0_i32_0 = arith.constant 0 : i32
    %c0_i32_1 = arith.constant 0 : i32
    %c0_i32_2 = arith.constant 0 : i32
    return %c0_i32, %c0_i32_0, %c0_i32_1 : i32, i32, i32
  }
  func.func @transform_11(%arg0: i32) -> (i32, i32, i32) {
    %c0_i32 = arith.constant 0 : i32
    %c0_i32_0 = arith.constant 0 : i32
    %c0_i32_1 = arith.constant 0 : i32
    %c0_i32_2 = arith.constant 0 : i32
    return %c0_i32, %c0_i32_0, %c0_i32_1 : i32, i32, i32
  }
  func.func @transform_12(%arg0: i32) -> (i32, i32, i32) {
    %c0_i32 = arith.constant 0 : i32
    %c0_i32_0 = arith.constant 0 : i32
    %c0_i32_1 = arith.constant 0 : i32
    %c0_i32_2 = arith.constant 0 : i32
    return %c0_i32, %c0_i32_0, %c0_i32_1 : i32, i32, i32
  }
  func.func @transform_13(%arg0: i32) -> (i32, i32, i32) {
    %c0_i32 = arith.constant 0 : i32
    %c0_i32_0 = arith.constant 0 : i32
    %c0_i32_1 = arith.constant 0 : i32
    %c0_i32_2 = arith.constant 0 : i32
    return %c0_i32, %c0_i32_0, %c0_i32_1 : i32, i32, i32
  }
}

</mosaic_0001>

<bundles_post_ra>
// kernel: gin_forward.1
= control target key start
LH: loop header
LB: loop body
LE: loop exit
PB: predicated region body
PF: predicated region fallthrough
CT: control target
= control target key end

     0   :  { %v3440_v1 = vmov 0   ;;  %v3441_v33 = vmov 0.0|0.0   ;;  %vm3442_vm0 = vmmov 0   ;;  %v3443_v34 = vmov 0.0   ;;  %s4665_s4 = inlined_call_operand.vmem [shape: bf16[128,128], index: 4, kind: input, shape index: {}]   ;;  %s4666_s0 = inlined_call_operand.vmem [shape: bf16[128,128], index: 0, kind: input, shape index: {}]   ;;  %s4667_s3 = inlined_call_operand.vmem [shape: f32[128,1], index: 3, kind: input, shape index: {}]   ;;  %s4668_s5 = inlined_call_operand.vmem [shape: f32[1,128], index: 5, kind: input, shape index: {}]   ;;  %s4669_s1 = inlined_call_operand.vmem [shape: bf16[128,128], index: 1, kind: input, shape index: {}]   ;;  %s4670_s6 = inlined_call_operand.vmem [shape: f32[1,128], index: 6, kind: input, shape index: {}]   ;;  %s4671_s7 = inlined_call_operand.vmem [shape: f32[1,128], index: 7, kind: input, shape index: {}]   ;;  %s4672_s2 = inlined_call_operand.vmem [shape: f32[8,128], index: 2, kind: input, shape index: {}]   ;;  %s4673_s8 = inlined_call_operand.vmem [shape: bf16[2,128,128], index: 8, kind: input, shape index: {}]   ;;  %s4674_s9 = inlined_call_operand.vmem [shape: bf16[2,128,128], index: 9, kind: input, shape index: {}]   ;;  %s4675_s12 = inlined_call_operand.vmem [shape: f32[3,8,128], index: 12, kind: output, shape index: {0}]   ;;  %s4676_s13 = inlined_call_operand.vmem [shape: f32[3,8,128], index: 13, kind: output, shape index: {1}]   ;;  %s4677_s10 = inlined_call_operand.vmem [shape: f32[2,1,128], index: 10, kind: input, shape index: {}]   ;;  %s4678_s11 = inlined_call_operand.vmem [shape: f32[2,1,128], index: 11, kind: input, shape index: {}]  }
   0x1   :  { %v3363_v0 = vld [vmem:[%s4665_s4] sm:$0xff]   ;;  %3361 = vset.pattern.permute.xlu0 %v3440_v1  ;;  %3362 = vset.pattern.permute.xlu1 %v3440_v1  ;;  %v3364_v2 = vld [vmem:[%s4665_s4 + $0x8] sm:$0xff]   ;;  %v3365_v3 = vld [vmem:[%s4665_s4 + $0x10] sm:$0xff]  }
   0x2   :  { %2779 = vmatprep.subr.bf16.mxu0 %v3363_v0  ;;  %v3366_v4 = vld [vmem:[%s4665_s4 + $0x18] sm:$0xff]   ;;  %v3371_v5 = vld [vmem:[%s4666_s0] sm:$0xff]   ;;  %v3368_v7 = vld [vmem:[%s4665_s4 + $0x28] sm:$0xff]   ;;  %3213 = vmatprep.subr.bf16.mxu1 %v3441_v33 }
   0x3   :  { %2780 = vmatpush3.bf16.msra.mxu0 %v3363_v0  ;;  %2795 = vmatprep.mubr.bf16.mxu0 %v3371_v5  ;;  %v3367_v6 = vld [vmem:[%s4665_s4 + $0x20] sm:$0xff]   ;;  %v46_v9 = vld [vmem:[%s4667_s3 + $0x10] sm:$0xff]  ;;  %v45_v10 = vld [vmem:[%s4667_s3 + $0x8] sm:$0xff] }
   0x4   :  { %2781 = vmatprep.subr.bf16.mxu0 %v3364_v2  ;;  %v44_v8 = vld [vmem:[%s4667_s3] sm:$0xff]  ;;  %323 = vperm.xlu1 %3362, %v46_v9   ;;  %v47_v11 = vld [vmem:[%s4667_s3 + $0x18] sm:$0xff]  ;;  %v3369_v12 = vld [vmem:[%s4665_s4 + $0x30] sm:$0xff]  }
   0x5   :  { %313 = vperm.xlu0 %3361, %v44_v8   ;;  %v48_v13 = vld [vmem:[%s4667_s3 + $0x20] sm:$0xff]  ;;  %v49_v14 = vld [vmem:[%s4667_s3 + $0x28] sm:$0xff]  ;;  %v3370_v15 = vld [vmem:[%s4665_s4 + $0x38] sm:$0xff]   ;;  %2843 = vmatprep.mubr.msk.f32.mxu1 %vm3442_vm0, %v3443_v34 }
   0x6   :  { %v50_v16 = vld [vmem:[%s4667_s3 + $0x30] sm:$0xff]  ;;  %v51_v17 = vld [vmem:[%s4667_s3 + $0x38] sm:$0xff]  ;;  %v3372_v18 = vld [vmem:[%s4666_s0 + $0x8] sm:$0xff]  }
   0x7   :  { %2782 = vmatpush3.bf16.msra.mxu0 %v3364_v2  ;;  %v52_v19 = vld [vmem:[%s4667_s3 + $0x40] sm:$0xff]  ;;  %v53_v20 = vld [vmem:[%s4667_s3 + $0x48] sm:$0xff]  ;;  %v3373_v21 = vld [vmem:[%s4666_s0 + $0x10] sm:$0xff]  }
   0x8   :  { %2783 = vmatprep.subr.bf16.mxu0 %v3365_v3  ;;  %328 = vperm.xlu1 %3362, %v47_v11   ;;  %v54_v22 = vld [vmem:[%s4667_s3 + $0x50] sm:$0xff]  ;;  %v55_v23 = vld [vmem:[%s4667_s3 + $0x58] sm:$0xff]  ;;  %v56_v25 = vld [vmem:[%s4667_s3 + $0x60] sm:$0xff] }
   0x9   :  { %318 = vperm.xlu0 %3361, %v45_v10   ;;  %v3374_v24 = vld [vmem:[%s4666_s0 + $0x18] sm:$0xff]   ;;  %v57_v26 = vld [vmem:[%s4667_s3 + $0x68] sm:$0xff]  ;;  %v3375_v27 = vld [vmem:[%s4666_s0 + $0x20] sm:$0xff]  }
   0xa   :  { %v58_v28 = vld [vmem:[%s4667_s3 + $0x70] sm:$0xff]  ;;  %v59_v29 = vld [vmem:[%s4667_s3 + $0x78] sm:$0xff]  ;;  %v3376_v30 = vld [vmem:[%s4666_s0 + $0x28] sm:$0xff]  }
   0xb   :  { %2784 = vmatpush3.bf16.msra.mxu0 %v3365_v3  ;;  %v3377_v31 = vld [vmem:[%s4666_s0 + $0x30] sm:$0xff]   ;;  %v3378_v32 = vld [vmem:[%s4666_s0 + $0x38] sm:$0xff]   ;;  %v3629_v40 = vld [vmem:[%s4668_s5] ss:$0 sm:$0xff] }
   0xc   :  { %2785 = vmatprep.subr.bf16.mxu0 %v3366_v4  ;;  %338 = vperm.xlu1 %3362, %v49_v14  }
   0xd   :  { %333 = vperm.xlu0 %3361, %v48_v13  }
   0xf   :  { %2786 = vmatpush3.bf16.msra.mxu0 %v3366_v4 }
  0x10   :  { %2787 = vmatprep.subr.bf16.mxu0 %v3367_v6  ;;  %348 = vperm.xlu1 %3362, %v51_v17  }
  0x11   :  { %343 = vperm.xlu0 %3361, %v50_v16  }
  0x13   :  { %2788 = vmatpush3.bf16.msra.mxu0 %v3367_v6 }
  0x14   :  { %2789 = vmatprep.subr.bf16.mxu0 %v3368_v7  ;;  %358 = vperm.xlu1 %3362, %v53_v20  }
  0x15   :  { %353 = vperm.xlu0 %3361, %v52_v19  }
  0x17   :  { %2790 = vmatpush3.bf16.msra.mxu0 %v3368_v7 }
  0x18   :  { %2791 = vmatprep.subr.bf16.mxu0 %v3369_v12  ;;  %368 = vperm.xlu1 %3362, %v55_v23  }
  0x19   :  { %363 = vperm.xlu0 %3361, %v54_v22  }
  0x1b   :  { %2792 = vmatpush3.bf16.msra.mxu0 %v3369_v12 }
  0x1c   :  { %2793 = vmatprep.subr.bf16.mxu0 %v3370_v15  ;;  %378 = vperm.xlu1 %3362, %v57_v26  }
  0x1d   :  { %373 = vperm.xlu0 %3361, %v56_v25  }
  0x1f   :  { %2794 = vmatpush3.bf16.msra.mxu0 %v3370_v15 }
  0x20   :  { %388 = vperm.xlu1 %3362, %v59_v29   ;;  %3237 = vmatprep.subr.bf16.mxu0 %v3441_v33 }
  0x21   :  { %383 = vperm.xlu0 %3361, %v58_v28  }
  0x22   :  { %2796 = vmatmul.mubr.bf16.vlgmr.msra.gmra.mrb[0].mxu0 %v3372_v18 }
  0x23   :  { %2799 = vmatprep.mubr.bf16.mxu0 %v3373_v21 }
  0x2a   :  { %2800 = vmatmul.mubr.bf16.gmra.mrb[4].mxu0 %v3374_v24 }
  0x2b   :  { %2803 = vmatprep.mubr.bf16.mxu0 %v3375_v27 }
  0x32   :  { %2804 = vmatmul.mubr.bf16.gmra.mrb[8].mxu0 %v3376_v30 }
  0x33   :  { %2807 = vmatprep.mubr.bf16.mxu0 %v3377_v31 }
  0x3a   :  { %2808 = vmatmul.mubr.bf16.gmra.mrb[12].mxu0 %v3378_v32 }
  0x3b   :  { %2878 = vmatprep.mubr.msk.f32.mxu0 %vm3442_vm0, %v3443_v34 }
  0x83   :  { %v3618_v36 = vpop.permute.xlu1 %323 }
  0x84   :  { %v3616_v35 = vpop.permute.xlu0 %313 }
  0x87   :  { %v3622_v38 = vpop.permute.xlu1 %328 }
  0x88   :  { %v3620_v37 = vpop.permute.xlu0 %318 }
  0x8b   :  { %v3631_v42 = vpop.permute.xlu1 %338 }
  0x8c   :  { %v3624_v39 = vpop.permute.xlu0 %333 }
  0x8f   :  { %v3648_v54 = vpop.permute.xlu1 %348 }
  0x90   :  { %v3636_v49 = vpop.permute.xlu0 %343 }
  0x93   :  { %v3674_v11 = vpop.permute.xlu1 %358 }
  0x94   :  { %v3660_v62 = vpop.permute.xlu0 %353 }
  0x97   :  { %v3698_v30 = vpop.permute.xlu1 %368 }
  0x98   :  { %v3688_v18 = vpop.permute.xlu0 %363 }
  0xf5   :  { %v2797_v41 = vpop.f32.mrb[0].mxu0 }
  0xf6   :  { %v246_v43 = vpop.f32.mrb[1].mxu0  ;;  %v255_v44 = vadd.f32 %v2797_v41, %v3629_v40 }
  0xf7   :  { %v247_v45 = vadd.f32 %v3629_v40, %v246_v43  ;;  %v2798_v46 = vpop.f32.mrb[2].mxu0 }
  0xf8   :  { %v258_v47 = vadd.f32 %v2798_v46, %v3629_v40  ;;  %v249_v48 = vpop.f32.mrb[3].mxu0  ;;  %v3643_v52 = vmul.f32 %v3618_v36, %v255_v44 }
  0xf9   :  { %v3639_v50 = vmul.f32 %v3616_v35, %v247_v45  ;;  %v250_v51 = vadd.f32 %v3629_v40, %v249_v48  ;;  %v3711_v48 = vpop.permute.xlu0 %373 }
  0xfa   :  { %v3651_v55 = vmul.f32 %v3622_v38, %v258_v47  ;;  %v431_v63 = vmul.f32 %v3643_v52, %v3643_v52 }
  0xfb   :  { %v3646_v53 = vmul.f32 %v3620_v37, %v250_v51  ;;  %v429_v56 = vmul.f32 %v3639_v50, %v3639_v50 }
  0xfc   :  { %v432_v4 = vmul.f32 %v3651_v55, %v3651_v55 }
  0xfd   :  { %v407_v57 = vadd.f32 %v3646_v53, %v3639_v50  ;;  %v430_v58 = vmul.f32 %v3646_v53, %v3646_v53  ;;  %v2801_v59 = vpop.f32.mrb[4].mxu0 }
  0xfe   :  { %v271_v60 = vadd.f32 %v2801_v59, %v3629_v40  ;;  %v262_v61 = vpop.f32.mrb[5].mxu0 }
  0xff   :  { %v408_v0 = vadd.f32 %v407_v57, %v3643_v52  ;;  %v445_v1 = vadd.f32 %v430_v58, %v429_v56  ;;  %v263_v2 = vadd.f32 %v3629_v40, %v262_v61  ;;  %v2802_v3 = vpop.f32.mrb[6].mxu0 }
 0x100   :  { %v274_v5 = vadd.f32 %v2802_v3, %v3629_v40  ;;  %v265_v6 = vpop.f32.mrb[7].mxu0  ;;  %v3677_v12 = vmul.f32 %v3636_v49, %v271_v60 }
 0x101   :  { %v446_v7 = vadd.f32 %v445_v1, %v431_v63  ;;  %v3670_v8 = vmul.f32 %v3624_v39, %v263_v2  ;;  %v409_v9 = vadd.f32 %v408_v0, %v3651_v55  ;;  %v266_v10 = vadd.f32 %v3629_v40, %v265_v6  ;;  %v3725_v1 = vpop.permute.xlu1 %378 }
 0x102   :  { %v3686_v17 = vmul.f32 %v3648_v54, %v274_v5  ;;  %v435_v25 = vmul.f32 %v3677_v12, %v3677_v12 }
 0x103   :  { %v410_v13 = vadd.f32 %v409_v9, %v3670_v8  ;;  %v433_v14 = vmul.f32 %v3670_v8, %v3670_v8  ;;  %v447_v15 = vadd.f32 %v446_v7, %v432_v4  ;;  %v3683_v16 = vmul.f32 %v3631_v42, %v266_v10 }
 0x104   :  { %v436_v31 = vmul.f32 %v3686_v17, %v3686_v17 }
 0x105   :  { %v448_v19 = vadd.f32 %v447_v15, %v433_v14  ;;  %v411_v20 = vadd.f32 %v410_v13, %v3683_v16  ;;  %v434_v21 = vmul.f32 %v3683_v16, %v3683_v16  ;;  %v2805_v22 = vpop.f32.mrb[8].mxu0  ;;  %v3735_v15 = vpop.permute.xlu0 %383 }
 0x106   :  { %v287_v23 = vadd.f32 %v2805_v22, %v3629_v40  ;;  %v278_v24 = vpop.f32.mrb[9].mxu0 }
 0x107   :  { %v412_v26 = vadd.f32 %v411_v20, %v3677_v12  ;;  %v449_v27 = vadd.f32 %v448_v19, %v434_v21  ;;  %v279_v28 = vadd.f32 %v3629_v40, %v278_v24  ;;  %v2806_v29 = vpop.f32.mrb[10].mxu0 }
 0x108   :  { %v290_v32 = vadd.f32 %v2806_v29, %v3629_v40  ;;  %v281_v41 = vpop.f32.mrb[11].mxu0  ;;  %v3709_v47 = vmul.f32 %v3688_v18, %v287_v23 }
 0x109   :  { %v450_v43 = vadd.f32 %v449_v27, %v435_v25  ;;  %v3704_v44 = vmul.f32 %v3660_v62, %v279_v28  ;;  %v413_v45 = vadd.f32 %v412_v26, %v3686_v17  ;;  %v282_v46 = vadd.f32 %v3629_v40, %v281_v41  ;;  %v3749_v28 = vpop.permute.xlu1 %388 }
 0x10a   :  { %v3720_v59 = vmul.f32 %v3698_v30, %v290_v32  ;;  %v439_v4 = vmul.f32 %v3709_v47, %v3709_v47 }
 0x10b   :  { %v414_v51 = vadd.f32 %v413_v45, %v3704_v44  ;;  %v437_v56 = vmul.f32 %v3704_v44, %v3704_v44  ;;  %v451_v57 = vadd.f32 %v450_v43, %v436_v31  ;;  %v3717_v58 = vmul.f32 %v3674_v11, %v282_v46 }
 0x10c   :  { %v440_v10 = vmul.f32 %v3720_v59, %v3720_v59 }
 0x10d   :  { %v452_v60 = vadd.f32 %v451_v57, %v437_v56  ;;  %v415_v61 = vadd.f32 %v414_v51, %v3717_v58  ;;  %v438_v63 = vmul.f32 %v3717_v58, %v3717_v58  ;;  %v2809_v0 = vpop.f32.mrb[12].mxu0 }
 0x10e   :  { %v303_v2 = vadd.f32 %v2809_v0, %v3629_v40  ;;  %v294_v3 = vpop.f32.mrb[13].mxu0 }
 0x10f   :  { %v416_v5 = vadd.f32 %v415_v61, %v3709_v47  ;;  %v453_v6 = vadd.f32 %v452_v60, %v438_v63  ;;  %v295_v7 = vadd.f32 %v3629_v40, %v294_v3  ;;  %v2810_v9 = vpop.f32.mrb[14].mxu0 }
 0x110   :  { %v306_v13 = vadd.f32 %v2810_v9, %v3629_v40  ;;  %v297_v14 = vpop.f32.mrb[15].mxu0  ;;  %v3743_v23 = vmul.f32 %v3735_v15, %v303_v2 }
 0x111   :  { %v454_v19 = vadd.f32 %v453_v6, %v439_v4  ;;  %v3738_v20 = vmul.f32 %v3711_v48, %v295_v7  ;;  %v417_v21 = vadd.f32 %v416_v5, %v3720_v59  ;;  %v298_v22 = vadd.f32 %v3629_v40, %v297_v14 }
 0x112   :  { %v3752_v31 = vmul.f32 %v3749_v28, %v306_v13  ;;  %v443_v40 = vmul.f32 %v3743_v23, %v3743_v23 }
 0x113   :  { %v418_v24 = vadd.f32 %v417_v21, %v3738_v20  ;;  %v441_v25 = vmul.f32 %v3738_v20, %v3738_v20  ;;  %v455_v26 = vadd.f32 %v454_v19, %v440_v10  ;;  %v404_v27 = vmul.f32 %v3725_v1, %v298_v22 }
 0x114   :  { %v444_v46 = vmul.f32 %v3752_v31, %v3752_v31 }
 0x115   :  { %v456_v29 = vadd.f32 %v455_v26, %v441_v25  ;;  %v419_v32 = vadd.f32 %v418_v24, %v404_v27  ;;  %v442_v41 = vmul.f32 %v404_v27, %v404_v27 }
 0x117   :  { %v420_v43 = vadd.f32 %v419_v32, %v3743_v23  ;;  %v457_v45 = vadd.f32 %v456_v29, %v442_v41 }
 0x119   :  { %v421_v51 = vadd.f32 %v420_v43, %v3752_v31  ;;  %v458_v56 = vadd.f32 %v457_v45, %v443_v40 }
 0x11b   :  { %v422_v57 = vrot.slane %v421_v51, 4  ;;  %v459_v60 = vadd.f32 %v458_v56, %v444_v46 }
 0x11d   :  { %v423_v61 = vadd.f32 %v422_v57, %v421_v51  ;;  %v460_v63 = vrot.slane %v459_v60, 4 }
 0x11f   :  { %v424_v0 = vrot.slane %v423_v61, 2  ;;  %v461_v2 = vadd.f32 %v460_v63, %v459_v60 }
 0x121   :  { %v425_v3 = vadd.f32 %v424_v0, %v423_v61  ;;  %v462_v4 = vrot.slane %v461_v2, 2 }
 0x123   :  { %v426_v5 = vrot.slane %v425_v3, 1  ;;  %v463_v6 = vadd.f32 %v462_v4, %v461_v2 }
 0x125   :  { %v427_v7 = vadd.f32 %v426_v5, %v425_v3  ;;  %v464_v9 = vrot.slane %v463_v6, 1 }
 0x127   :  { %v3760_v10 = vmul.f32 0.0625, %v427_v7  ;;  %v465_v13 = vadd.f32 %v464_v9, %v463_v6 }
 0x129   :  { %v466_v14 = vmul.f32 0.0625, %v465_v13  ;;  %v467_v19 = vmul.f32 %v3760_v10, %v3760_v10  ;;  %v483_v21 = vsub.f32 %v404_v27, %v3760_v10  ;;  %v470_v22 = vsub.f32 %v3639_v50, %v3760_v10 }
 0x12a   :  { %v471_v24 = vsub.f32 %v3646_v53, %v3760_v10  ;;  %v472_v25 = vsub.f32 %v3643_v52, %v3760_v10  ;;  %v473_v26 = vsub.f32 %v3651_v55, %v3760_v10  ;;  %v474_v29 = vsub.f32 %v3670_v8, %v3760_v10 }
 0x12b   :  { %v468_v32 = vsub.f32 %v466_v14, %v467_v19  ;;  %v475_v41 = vsub.f32 %v3683_v16, %v3760_v10  ;;  %v476_v50 = vsub.f32 %v3677_v12, %v3760_v10  ;;  %v477_v53 = vsub.f32 %v3686_v17, %v3760_v10 }
 0x12c   :  { %v478_v52 = vsub.f32 %v3704_v44, %v3760_v10  ;;  %v479_v55 = vsub.f32 %v3717_v58, %v3760_v10  ;;  %v480_v8 = vsub.f32 %v3709_v47, %v3760_v10  ;;  %v481_v40 = vsub.f32 %v3720_v59, %v3760_v10  ;;  %v2481_v44 = vld [vmem:[%s4670_s6] ss:$0 sm:$0xff] }
 0x12d   :  { %v469_v27 = vmax.f32 %v468_v32, 0.0  ;;  %v482_v43 = vsub.f32 %v3738_v20, %v3760_v10  ;;  %v484_v12 = vsub.f32 %v3743_v23, %v3760_v10  ;;  %v485_v17 = vsub.f32 %v3752_v31, %v3760_v10  ;;  %v3803_v20 = vld [vmem:[%s4671_s7] ss:$0 sm:$0xff] }
 0x12e   :  { %v505_v58 = vmul.f32 %v2481_v44, %v483_v21  ;;  %v492_v47 = vmul.f32 %v2481_v44, %v470_v22  ;;  %v493_v45 = vmul.f32 %v2481_v44, %v471_v24  ;;  %v494_v46 = vmul.f32 %v2481_v44, %v472_v25 }
 0x12f   :  { %v508_v16 = vadd.f32 1e-05, %v469_v27  ;;  %v495_v59 = vmul.f32 %v2481_v44, %v473_v26  ;;  %v496_v23 = vmul.f32 %v2481_v44, %v474_v29  ;;  %v497_v56 = vmul.f32 %v2481_v44, %v475_v41 }
 0x130   :  { %v498_v57 = vmul.f32 %v2481_v44, %v476_v50  ;;  %v499_v31 = vmul.f32 %v2481_v44, %v477_v53  ;;  %v500_v26 = vmul.f32 %v2481_v44, %v478_v52  ;;  %v501_v29 = vmul.f32 %v2481_v44, %v479_v55 }
 0x131   :  { %3419 = vrsqrt.f32 %v508_v16  ;;  %v502_v32 = vmul.f32 %v2481_v44, %v480_v8  ;;  %v503_v55 = vmul.f32 %v2481_v44, %v481_v40 }
 0x13b   :  { %v3798_v51 = vpop.eup %3419 }
 0x13c   :  { %v3806_v60 = vmul.f32 %v3798_v51, %v505_v58  ;;  %v510_v61 = vmul.f32 %v3798_v51, %v492_v47  ;;  %v511_v63 = vmul.f32 %v3798_v51, %v493_v45  ;;  %v512_v0 = vmul.f32 %v3798_v51, %v494_v46 }
 0x13d   :  { %v513_v2 = vmul.f32 %v3798_v51, %v495_v59  ;;  %v514_v3 = vmul.f32 %v3798_v51, %v496_v23  ;;  %v515_v4 = vmul.f32 %v3798_v51, %v497_v56  ;;  %v516_v5 = vmul.f32 %v3798_v51, %v498_v57 }
 0x13e   :  { %v532_v6 = vadd.f32 %v3803_v20, %v510_v61  ;;  %v533_v7 = vadd.f32 %v3803_v20, %v511_v63  ;;  %v534_v9 = vadd.f32 %v3803_v20, %v512_v0  ;;  %v517_v10 = vmul.f32 %v3798_v51, %v499_v31 }
 0x13f   :  { %v535_v13 = vadd.f32 %v3803_v20, %v513_v2  ;;  %v536_v14 = vadd.f32 %v3803_v20, %v514_v3  ;;  %v537_v19 = vadd.f32 %v3803_v20, %v515_v4  ;;  %v538_v53 = vadd.f32 %v3803_v20, %v516_v5 }
 0x140   :  { %v3823_v21 = vmul.f32 %v532_v6, %v3616_v35  ;;  %v3826_v22 = vmul.f32 %v533_v7, %v3620_v37  ;;  %v3829_v24 = vmul.f32 %v534_v9, %v3618_v36  ;;  %v539_v52 = vadd.f32 %v3803_v20, %v517_v10 }
 0x141   :  { %v3832_v25 = vmul.f32 %v535_v13, %v3622_v38  ;;  %v3844_v16 = vmul.f32 %v536_v14, %v3624_v39  ;;  %v3847_v58 = vmul.f32 %v537_v19, %v3631_v42  ;;  %v504_v46 = vmul.f32 %v2481_v44, %v482_v43 }
 0x142   :  { %v3836_v41 = vpack.c.bf16 %v3826_v22, %v3823_v21  ;;  %v634_v27 = vmul.f32 %v3823_v21, %v3823_v21  ;;  %v635_v50 = vmul.f32 %v3826_v22, %v3826_v22  ;;  %v636_v47 = vmul.f32 %v3829_v24, %v3829_v24 }
 0x143   :  { %v637_v45 = vmul.f32 %v3832_v25, %v3832_v25  ;;  %v518_v59 = vmul.f32 %v3798_v51, %v500_v26  ;;  %v519_v23 = vmul.f32 %v3798_v51, %v501_v29  ;;  %v520_v56 = vmul.f32 %v3798_v51, %v502_v32 }
 0x144   :  { %3215 = vmatpush3.bf16.msra.mxu1 %v3836_v41  ;;  %v3238_v8 = vpack.c.bf16 %v635_v50, %v634_v27  ;;  %v506_v57 = vmul.f32 %v2481_v44, %v484_v12  ;;  %v3861_v40 = vpack.c.bf16 %v3832_v25, %v3829_v24  ;;  %v3864_v31 = vmul.f32 %v538_v53, %v3636_v49 }
 0x145   :  { %3216 = vmatprep.subr.bf16.mxu1 %v3441_v33  ;;  %v521_v61 = vmul.f32 %v3798_v51, %v503_v55  ;;  %v507_v43 = vmul.f32 %v2481_v44, %v485_v17  ;;  %v638_v63 = vmul.f32 %v3844_v16, %v3844_v16  ;;  %v639_v0 = vmul.f32 %v3847_v58, %v3847_v58 }
 0x146   :  { %3239 = vmatpush3.bf16.msra.mxu0 %v3238_v8  ;;  %v3873_v12 = vmul.f32 %v539_v52, %v3648_v54  ;;  %v522_v2 = vmul.f32 %v3798_v51, %v504_v46  ;;  %v3241_v3 = vpack.c.bf16 %v637_v45, %v636_v47  ;;  %v540_v4 = vadd.f32 %v3803_v20, %v518_v59 }
 0x147   :  { %3240 = vmatprep.subr.bf16.mxu0 %v3441_v33  ;;  %v541_v17 = vadd.f32 %v3803_v20, %v519_v23  ;;  %v524_v44 = vmul.f32 %v3798_v51, %v506_v57  ;;  %v3883_v5 = vpack.c.bf16 %v3847_v58, %v3844_v16  ;;  %v525_v6 = vmul.f32 %v3798_v51, %v507_v43 }
 0x148   :  { %3218 = vmatpush3.bf16.msra.mxu1 %v3861_v40  ;;  %v640_v7 = vmul.f32 %v3864_v31, %v3864_v31  ;;  %v641_v9 = vmul.f32 %v3873_v12, %v3873_v12  ;;  %v542_v10 = vadd.f32 %v3803_v20, %v520_v56  ;;  %v3244_v13 = vpack.c.bf16 %v639_v0, %v638_v63 }
 0x149   :  { %3219 = vmatprep.subr.bf16.mxu1 %v3441_v33  ;;  %v3894_v14 = vmul.f32 %v540_v4, %v3660_v62  ;;  %v3897_v19 = vmul.f32 %v541_v17, %v3674_v11  ;;  %v543_v51 = vadd.f32 %v3803_v20, %v521_v61  ;;  %v3223_v26 = vpack.c.bf16 %v3873_v12, %v3864_v31 }
 0x14a   :  { %3242 = vmatpush3.bf16.msra.mxu0 %v3241_v3  ;;  %v3247_v29 = vpack.c.bf16 %v641_v9, %v640_v7  ;;  %v3905_v32 = vmul.f32 %v542_v10, %v3688_v18  ;;  %v545_v27 = vadd.f32 %v3803_v20, %v3806_v60  ;;  %v544_v55 = vadd.f32 %v3803_v20, %v522_v2  ;;  %v60_v7 = vld [vmem:[%s4672_s2] sm:$0xff] }
 0x14b   :  { %3243 = vmatprep.subr.bf16.mxu0 %v3441_v33  ;;  %v642_v50 = vmul.f32 %v3894_v14, %v3894_v14  ;;  %v643_v53 = vmul.f32 %v3897_v19, %v3897_v19  ;;  %v3914_v52 = vmul.f32 %v543_v51, %v3698_v30  ;;  %v3226_v8 = vpack.c.bf16 %v3897_v19, %v3894_v14  ;;  %v3379_v9 = vld [vmem:[%s4669_s1] sm:$0xff]   ;;  %v3385_v51 = vld [vmem:[%s4669_s1 + $0x30] sm:$0xff]  }
 0x14c   :  { %3221 = vmatpush3.bf16.msra.mxu1 %v3883_v5  ;;  %v644_v60 = vmul.f32 %v3905_v32, %v3905_v32  ;;  %v3924_v47 = vmul.f32 %v545_v27, %v3725_v1  ;;  %v546_v45 = vadd.f32 %v3803_v20, %v524_v44  ;;  %v3930_v23 = vmul.f32 %v544_v55, %v3711_v48  ;;  %v3383_v10 = vld [vmem:[%s4669_s1 + $0x20] sm:$0xff]   ;;  %v3388_v27 = vld [vmem:[%s4673_s8 + $0x8] sm:$0xff]  }
 0x14d   :  { %3222 = vmatprep.subr.bf16.mxu1 %v3441_v33  ;;  %v3250_v46 = vpack.c.bf16 %v643_v53, %v642_v50  ;;  %v645_v59 = vmul.f32 %v3914_v52, %v3914_v52  ;;  %v547_v56 = vadd.f32 %v3803_v20, %v525_v6  ;;  %v3229_v57 = vpack.c.bf16 %v3914_v52, %v3905_v32  ;;  %v3389_v50 = vld [vmem:[%s4673_s8 + $0x10] sm:$0xff]   ;;  %v3390_v53 = vld [vmem:[%s4673_s8 + $0x18] sm:$0xff]   ;;  %v3391_v55 = vld [vmem:[%s4673_s8 + $0x20] sm:$0xff]  }
 0x14e   :  { %3245 = vmatpush3.bf16.msra.mxu0 %v3244_v13  ;;  %v647_v61 = vmul.f32 %v3924_v47, %v3924_v47  ;;  %v646_v63 = vmul.f32 %v3930_v23, %v3930_v23  ;;  %v3942_v0 = vmul.f32 %v546_v45, %v3735_v15  ;;  %v3232_v2 = vpack.c.bf16 %v3924_v47, %v3930_v23  ;;  %v3384_v13 = vld [vmem:[%s4669_s1 + $0x28] sm:$0xff]   ;;  %v3394_v45 = vld [vmem:[%s4673_s8 + $0x38] sm:$0xff]  }
 0x14f   :  { %3246 = vmatprep.subr.bf16.mxu0 %v3441_v33  ;;  %v3253_v43 = vpack.c.bf16 %v645_v59, %v644_v60  ;;  %v3945_v20 = vmul.f32 %v547_v56, %v3749_v28  ;;  %v3393_v60 = vld [vmem:[%s4673_s8 + $0x30] sm:$0xff]   ;;  %v3396_v59 = vld [vmem:[%s4674_s9 + $0x8] sm:$0xff]  }
 0x150   :  { %3224 = vmatpush3.bf16.msra.mxu1 %v3223_v26  ;;  %v3256_v3 = vpack.c.bf16 %v647_v61, %v646_v63  ;;  %v648_v4 = vmul.f32 %v3942_v0, %v3942_v0  ;;  %v3397_v56 = vld [vmem:[%s4674_s9 + $0x10] sm:$0xff]   ;;  %v3399_v61 = vld [vmem:[%s4674_s9 + $0x20] sm:$0xff]  }
 0x151   :  { %3225 = vmatprep.subr.bf16.mxu1 %v3441_v33  ;;  %v649_v17 = vmul.f32 %v3945_v20, %v3945_v20  ;;  %v3235_v44 = vpack.c.bf16 %v3945_v20, %v3942_v0 }
 0x152   :  { %3248 = vmatpush3.bf16.msra.mxu0 %v3247_v29  ;;  %v3387_v29 = vld [vmem:[%s4673_s8] sm:$0xff]  }
 0x153   :  { %3249 = vmatprep.subr.bf16.mxu0 %v3441_v33  ;;  %v3259_v6 = vpack.c.bf16 %v649_v17, %v648_v4 }
 0x154   :  { %3227 = vmatpush3.bf16.msra.mxu1 %v3226_v8 }
 0x155   :  { %3228 = vmatprep.subr.bf16.mxu1 %v3441_v33 }
 0x156   :  { %3251 = vmatpush3.bf16.msra.mxu0 %v3250_v46  ;;  %v3395_v46 = vld [vmem:[%s4674_s9] sm:$0xff]  }
 0x157   :  { %3252 = vmatprep.subr.bf16.mxu0 %v3441_v33 }
 0x158   :  { %3230 = vmatpush3.bf16.msra.mxu1 %v3229_v57 }
 0x159   :  { %3231 = vmatprep.subr.bf16.mxu1 %v3441_v33 }
 0x15a   :  { %3254 = vmatpush3.bf16.msra.mxu0 %v3253_v43  ;;  %v3400_v43 = vld [vmem:[%s4674_s9 + $0x28] sm:$0xff]  }
 0x15b   :  { %3255 = vmatprep.subr.bf16.mxu0 %v3441_v33 }
 0x15c   :  { %3233 = vmatpush3.bf16.msra.mxu1 %v3232_v2 }
 0x15d   :  { %3234 = vmatprep.subr.bf16.mxu1 %v3441_v33 }
 0x15e   :  { %3257 = vmatpush3.bf16.msra.mxu0 %v3256_v3 }
 0x15f   :  { %3258 = vmatprep.subr.bf16.mxu0 %v3441_v33 }
 0x160   :  { %3236 = vmatpush3.bf16.msra.mxu1 %v3235_v44 }
 0x161   :  { %2881 = vmatprep.subr.bf16.mxu1 %v3836_v41 }
 0x162   :  { %3260 = vmatpush3.bf16.msra.mxu0 %v3259_v6 }
 0x163   :  { %2844 = vmatmul.mubr.f32.vlgmr.msra.gmra.mrb[0].mxu1 %v60_v7  ;;  %2913 = vmatprep.subr.bf16.mxu0 %v3387_v29 }
 0x164   :  { %2882 = vmatpush3.bf16.msra.mxu1 %v3836_v41  ;;  %2897 = vmatprep.mubr.bf16.mxu1 %v3379_v9  ;;  %v3380_v41 = vld [vmem:[%s4669_s1 + $0x8] sm:$0xff]  }
 0x165   :  { %2879 = vmatmul.mubr.f32.vlgmr.msra.gmra.mrb[16].mxu0 %v60_v7  ;;  %2883 = vmatprep.subr.bf16.mxu1 %v3861_v40 }
 0x166   :  { %2914 = vmatpush3.bf16.msra.mxu0 %v3387_v29 }
 0x167   :  { %2915 = vmatprep.subr.bf16.mxu0 %v3388_v27 }
 0x168   :  { %2884 = vmatpush3.bf16.msra.mxu1 %v3861_v40  ;;  %v3381_v40 = vld [vmem:[%s4669_s1 + $0x10] sm:$0xff]  }
 0x169   :  { %2885 = vmatprep.subr.bf16.mxu1 %v3883_v5 }
 0x16a   :  { %2916 = vmatpush3.bf16.msra.mxu0 %v3388_v27 }
 0x16b   :  { %2917 = vmatprep.subr.bf16.mxu0 %v3389_v50 }
 0x16c   :  { %2886 = vmatpush3.bf16.msra.mxu1 %v3883_v5  ;;  %v3382_v5 = vld [vmem:[%s4669_s1 + $0x18] sm:$0xff]  }
 0x16d   :  { %2887 = vmatprep.subr.bf16.mxu1 %v3223_v26 }
 0x16e   :  { %2918 = vmatpush3.bf16.msra.mxu0 %v3389_v50 }
 0x16f   :  { %2919 = vmatprep.subr.bf16.mxu0 %v3390_v53 }
 0x170   :  { %2888 = vmatpush3.bf16.msra.mxu1 %v3223_v26  ;;  %v3386_v26 = vld [vmem:[%s4669_s1 + $0x38] sm:$0xff]  }
 0x171   :  { %2889 = vmatprep.subr.bf16.mxu1 %v3226_v8 }
 0x172   :  { %2920 = vmatpush3.bf16.msra.mxu0 %v3390_v53 }
 0x173   :  { %2921 = vmatprep.subr.bf16.mxu0 %v3391_v55 }
 0x174   :  { %2890 = vmatpush3.bf16.msra.mxu1 %v3226_v8  ;;  %v3392_v8 = vld [vmem:[%s4673_s8 + $0x28] sm:$0xff]  }
 0x175   :  { %2891 = vmatprep.subr.bf16.mxu1 %v3229_v57 }
 0x176   :  { %2922 = vmatpush3.bf16.msra.mxu0 %v3391_v55 }
 0x177   :  { %2923 = vmatprep.subr.bf16.mxu0 %v3392_v8 }
 0x178   :  { %2892 = vmatpush3.bf16.msra.mxu1 %v3229_v57  ;;  %v3398_v57 = vld [vmem:[%s4674_s9 + $0x18] sm:$0xff]  }
 0x179   :  { %2893 = vmatprep.subr.bf16.mxu1 %v3232_v2 }
 0x17a   :  { %2924 = vmatpush3.bf16.msra.mxu0 %v3392_v8 }
 0x17b   :  { %2925 = vmatprep.subr.bf16.mxu0 %v3393_v60 }
 0x17c   :  { %2894 = vmatpush3.bf16.msra.mxu1 %v3232_v2 }
 0x17d   :  { %2895 = vmatprep.subr.bf16.mxu1 %v3235_v44 }
 0x17e   :  { %2926 = vmatpush3.bf16.msra.mxu0 %v3393_v60 }
 0x17f   :  { %2927 = vmatprep.subr.bf16.mxu0 %v3394_v45 }
 0x180   :  { %2896 = vmatpush3.bf16.msra.mxu1 %v3235_v44 }
 0x181   :  { %2945 = vmatprep.subr.bf16.mxu1 %v3395_v46 }
 0x182   :  { %2928 = vmatpush3.bf16.msra.mxu0 %v3394_v45 }
 0x183   :  { %2898 = vmatmul.mubr.bf16.vlgmr.msra.gmra.mrb[4].mxu1 %v3380_v41  ;;  %3261 = vmatprep.subr.bf16.mxu0 %v3441_v33 }
 0x184   :  { %2901 = vmatprep.mubr.bf16.mxu1 %v3381_v40  ;;  %2946 = vmatpush3.bf16.msra.mxu1 %v3395_v46 }
 0x185   :  { %2947 = vmatprep.subr.bf16.mxu1 %v3396_v59 }
 0x188   :  { %2948 = vmatpush3.bf16.msra.mxu1 %v3396_v59 }
 0x189   :  { %2949 = vmatprep.subr.bf16.mxu1 %v3397_v56 }
 0x18b   :  { %2902 = vmatmul.mubr.bf16.gmra.mrb[8].mxu1 %v3382_v5 }
 0x18c   :  { %2905 = vmatprep.mubr.bf16.mxu1 %v3383_v10  ;;  %2950 = vmatpush3.bf16.msra.mxu1 %v3397_v56 }
 0x18d   :  { %2951 = vmatprep.subr.bf16.mxu1 %v3398_v57 }
 0x190   :  { %2952 = vmatpush3.bf16.msra.mxu1 %v3398_v57 }
 0x191   :  { %2953 = vmatprep.subr.bf16.mxu1 %v3399_v61 }
 0x193   :  { %2906 = vmatmul.mubr.bf16.gmra.mrb[12].mxu1 %v3384_v13 }
 0x194   :  { %2909 = vmatprep.mubr.bf16.mxu1 %v3385_v51  ;;  %2954 = vmatpush3.bf16.msra.mxu1 %v3399_v61 }
 0x195   :  { %2955 = vmatprep.subr.bf16.mxu1 %v3400_v43 }
 0x198   :  { %2956 = vmatpush3.bf16.msra.mxu1 %v3400_v43 }
 0x19b   :  { %2910 = vmatmul.mubr.bf16.gmra.mrb[16].mxu1 %v3386_v26 }
 0x236   :  { %v630_v63 = vpop.f32.mrb[0].mxu1 }
 0x237   :  { %v720_v2 = vmul.f32 %v630_v63, %v630_v63  ;;  %731 = vst [vmem:[%s4675_s12] sm:$0xff] %v630_v63  ;;  %v2845_v3 = vpop.f32.mrb[1].mxu1 }
 0x238   :  { %v716_v4 = vpop.f32.mrb[16].mxu0 }
 0x239   :  { %v721_v17 = vsub.f32 %v716_v4, %v720_v2  ;;  %v2880_v44 = vpop.f32.mrb[17].mxu0 }
 0x23b   :  { %v722_v6 = vmax.f32 %v721_v17, 0.0 }
 0x23d   :  { %3421 = vrsqrt.f32 %v722_v6  ;;  %vm725_vm1 = vcmp.eq.f32.partialorder %v722_v6, inf  ;;  %v728_v41 = vand.u32 2147483648, %v722_v6  ;;  %vm727_vm2 = vcmp.eq.f32.partialorder %v722_v6, 0.0 }
 0x247   :  { %v3422_v7 = vpop.eup %3421 }
 0x248   :  { %v724_v9 = vmul.f32 %v3422_v7, %v722_v6 }
 0x24a   :  { %v726_v40 = vsel %vm725_vm1, %v722_v6, %v724_v9 }
 0x24b   :  { %v729_v5 = vsel %vm727_vm2, %v728_v41, %v726_v40 }
 0x24c   :  { %730 = vst [vmem:[%s4676_s13] sm:$0xff] %v729_v5 }
 0x256   :  { %v2899_v10 = vpop.f32.mrb[4].mxu1 }
 0x257   :  { %v822_v13 = vpop.f32.mrb[5].mxu1  ;;  %v887_v26 = vadd.f32 %v2899_v10, %v3829_v24 }
 0x258   :  { %v2900_v51 = vpop.f32.mrb[6].mxu1  ;;  %v885_v50 = vadd.f32 %v822_v13, %v3823_v21 }
 0x259   :  { %v888_v29 = vadd.f32 %v2900_v51, %v3832_v25  ;;  %v825_v27 = vpop.f32.mrb[7].mxu1 }
 0x25a   :  { %v886_v53 = vadd.f32 %v825_v27, %v3826_v22 }
 0x25b   :  { %v902_v55 = vpack.c.bf16 %v888_v29, %v887_v26 }
 0x25c   :  { %v901_v8 = vpack.c.bf16 %v886_v53, %v885_v50 }
 0x25e   :  { %v2903_v60 = vpop.f32.mrb[8].mxu1  ;;  %2929 = vmatprep.mubr.bf16.mxu0 %v901_v8 }
 0x25f   :  { %v838_v45 = vpop.f32.mrb[9].mxu1  ;;  %2930 = vmatmul.mubr.bf16.vlgmr.msra.gmra.mrb[20].mxu0 %v902_v55  ;;  %v891_v59 = vadd.f32 %v2903_v60, %v3864_v31 }
 0x260   :  { %v2904_v46 = vpop.f32.mrb[10].mxu1  ;;  %v889_v24 = vadd.f32 %v838_v45, %v3844_v16 }
 0x261   :  { %v892_v56 = vadd.f32 %v2904_v46, %v3873_v12  ;;  %v841_v57 = vpop.f32.mrb[11].mxu1 }
 0x262   :  { %v890_v25 = vadd.f32 %v841_v57, %v3847_v58 }
 0x263   :  { %v904_v61 = vpack.c.bf16 %v892_v56, %v891_v59 }
 0x264   :  { %v903_v21 = vpack.c.bf16 %v890_v25, %v889_v24 }
 0x266   :  { %v2907_v43 = vpop.f32.mrb[12].mxu1  ;;  %2933 = vmatprep.mubr.bf16.mxu0 %v903_v21 }
 0x267   :  { %v854_v22 = vpop.f32.mrb[13].mxu1  ;;  %2934 = vmatmul.mubr.bf16.gmra.mrb[24].mxu0 %v904_v61  ;;  %v895_v2 = vadd.f32 %v2907_v43, %v3905_v32 }
 0x268   :  { %v2908_v63 = vpop.f32.mrb[14].mxu1  ;;  %v893_v31 = vadd.f32 %v854_v22, %v3894_v14 }
 0x269   :  { %v896_v3 = vadd.f32 %v2908_v63, %v3914_v52  ;;  %v857_v4 = vpop.f32.mrb[15].mxu1 }
 0x26a   :  { %v894_v12 = vadd.f32 %v857_v4, %v3897_v19  ;;  %v3401_v19 = vld [vmem:[%s4674_s9 + $0x30] sm:$0xff]  }
 0x26b   :  { %v906_v17 = vpack.c.bf16 %v896_v3, %v895_v2  ;;  %2957 = vmatprep.subr.bf16.mxu1 %v3401_v19 }
 0x26c   :  { %v905_v16 = vpack.c.bf16 %v894_v12, %v893_v31  ;;  %2958 = vmatpush3.bf16.msra.mxu1 %v3401_v19 }
 0x26e   :  { %v2911_v44 = vpop.f32.mrb[16].mxu1  ;;  %2937 = vmatprep.mubr.bf16.mxu0 %v905_v16 }
 0x26f   :  { %v870_v58 = vpop.f32.mrb[17].mxu1  ;;  %2938 = vmatmul.mubr.bf16.gmra.mrb[28].mxu0 %v906_v17  ;;  %v899_v7 = vadd.f32 %v2911_v44, %v3942_v0  ;;  %v3402_v0 = vld [vmem:[%s4674_s9 + $0x38] sm:$0xff]  }
 0x270   :  { %v2912_v6 = vpop.f32.mrb[18].mxu1  ;;  %v897_v32 = vadd.f32 %v870_v58, %v3930_v23  ;;  %2959 = vmatprep.subr.bf16.mxu1 %v3402_v0 }
 0x271   :  { %v900_v9 = vadd.f32 %v2912_v6, %v3945_v20  ;;  %v873_v41 = vpop.f32.mrb[19].mxu1  ;;  %2960 = vmatpush3.bf16.msra.mxu1 %v3402_v0 }
 0x272   :  { %v898_v52 = vadd.f32 %v873_v41, %v3924_v47  ;;  %3285 = vmatprep.subr.bf16.mxu1 %v3441_v33 }
 0x273   :  { %v908_v40 = vpack.c.bf16 %v900_v9, %v899_v7 }
 0x274   :  { %v907_v14 = vpack.c.bf16 %v898_v52, %v897_v32 }
 0x276   :  { %2941 = vmatprep.mubr.bf16.mxu0 %v907_v14 }
 0x277   :  { %2942 = vmatmul.mubr.bf16.gmra.mrb[32].mxu0 %v908_v40 }
 0x278   :  { %3009 = vmatprep.mubr.msk.f32.mxu0 %vm3442_vm0, %v3443_v34 }
 0x332   :  { %v2931_v47 = vpop.f32.mrb[20].mxu0 }
 0x333   :  { %v1007_v23 = vpop.f32.mrb[21].mxu0  ;;  %v1072_v5 = vmax.f32 %v2931_v47, 0.0 }
 0x334   :  { %v2932_v20 = vpop.f32.mrb[22].mxu0  ;;  %v1070_v51 = vmax.f32 %v1007_v23, 0.0 }
 0x335   :  { %v1073_v10 = vmax.f32 %v2932_v20, 0.0  ;;  %v1010_v13 = vpop.f32.mrb[23].mxu0 }
 0x336   :  { %v1071_v26 = vmax.f32 %v1010_v13, 0.0 }
 0x337   :  { %v1087_v29 = vpack.c.bf16 %v1073_v10, %v1072_v5 }
 0x338   :  { %v1086_v27 = vpack.c.bf16 %v1071_v26, %v1070_v51 }
 0x33a   :  { %v2935_v50 = vpop.f32.mrb[24].mxu0  ;;  %2961 = vmatprep.mubr.bf16.mxu1 %v1086_v27 }
 0x33b   :  { %v1023_v53 = vpop.f32.mrb[25].mxu0  ;;  %2962 = vmatmul.mubr.bf16.vlgmr.msra.gmra.mrb[20].mxu1 %v1087_v29  ;;  %v1076_v8 = vmax.f32 %v2935_v50, 0.0 }
 0x33c   :  { %v2936_v55 = vpop.f32.mrb[26].mxu0  ;;  %v1074_v46 = vmax.f32 %v1023_v53, 0.0 }
 0x33d   :  { %v1077_v60 = vmax.f32 %v2936_v55, 0.0  ;;  %v1026_v45 = vpop.f32.mrb[27].mxu0 }
 0x33e   :  { %v1075_v59 = vmax.f32 %v1026_v45, 0.0 }
 0x33f   :  { %v1089_v56 = vpack.c.bf16 %v1077_v60, %v1076_v8 }
 0x340   :  { %v1088_v57 = vpack.c.bf16 %v1075_v59, %v1074_v46 }
 0x342   :  { %v2939_v24 = vpop.f32.mrb[28].mxu0  ;;  %2965 = vmatprep.mubr.bf16.mxu1 %v1088_v57 }
 0x343   :  { %v1039_v25 = vpop.f32.mrb[29].mxu0  ;;  %2966 = vmatmul.mubr.bf16.gmra.mrb[24].mxu1 %v1089_v56  ;;  %v1080_v21 = vmax.f32 %v2939_v24, 0.0 }
 0x344   :  { %v2940_v61 = vpop.f32.mrb[30].mxu0  ;;  %v1078_v63 = vmax.f32 %v1039_v25, 0.0 }
 0x345   :  { %v1081_v43 = vmax.f32 %v2940_v61, 0.0  ;;  %v1042_v22 = vpop.f32.mrb[31].mxu0 }
 0x346   :  { %v1079_v2 = vmax.f32 %v1042_v22, 0.0 }
 0x347   :  { %v1091_v3 = vpack.c.bf16 %v1081_v43, %v1080_v21 }
 0x348   :  { %v1090_v4 = vpack.c.bf16 %v1079_v2, %v1078_v63 }
 0x34a   :  { %v2943_v31 = vpop.f32.mrb[32].mxu0  ;;  %2969 = vmatprep.mubr.bf16.mxu1 %v1090_v4 }
 0x34b   :  { %v1055_v12 = vpop.f32.mrb[33].mxu0  ;;  %2970 = vmatmul.mubr.bf16.gmra.mrb[28].mxu1 %v1091_v3  ;;  %v1084_v16 = vmax.f32 %v2943_v31, 0.0 }
 0x34c   :  { %v2944_v17 = vpop.f32.mrb[34].mxu0  ;;  %v1082_v6 = vmax.f32 %v1055_v12, 0.0 }
 0x34d   :  { %v1085_v44 = vmax.f32 %v2944_v17, 0.0  ;;  %v1058_v58 = vpop.f32.mrb[35].mxu0 }
 0x34e   :  { %v1083_v7 = vmax.f32 %v1058_v58, 0.0 }
 0x34f   :  { %v1093_v9 = vpack.c.bf16 %v1085_v44, %v1084_v16 }
 0x350   :  { %v1092_v41 = vpack.c.bf16 %v1083_v7, %v1082_v6 }
 0x352   :  { %2973 = vmatprep.mubr.bf16.mxu1 %v1092_v41 }
 0x353   :  { %2974 = vmatmul.mubr.bf16.gmra.mrb[32].mxu1 %v1093_v9 }
 0x354   :  { %3044 = vmatprep.mubr.msk.f32.mxu1 %vm3442_vm0, %v3443_v34 }
 0x40e   :  { %v2963_v32 = vpop.f32.mrb[20].mxu1 }
 0x40f   :  { %v1192_v52 = vpop.f32.mrb[21].mxu1  ;;  %v1257_v40 = vmax.f32 %v2963_v32, 0.0 }
 0x410   :  { %v1255_v14 = vmax.f32 %v1192_v52, 0.0  ;;  %v2964_v19 = vpop.f32.mrb[22].mxu1 }
 0x411   :  { %v1258_v0 = vmax.f32 %v2964_v19, 0.0  ;;  %v1195_v47 = vpop.f32.mrb[23].mxu1  ;;  %v4072_v5 = vmul.f32 %v1257_v40, %v3618_v36 }
 0x412   :  { %v4069_v23 = vmul.f32 %v1255_v14, %v3616_v35  ;;  %v1256_v20 = vmax.f32 %v1195_v47, 0.0 }
 0x413   :  { %v4078_v13 = vmul.f32 %v1258_v0, %v3622_v38  ;;  %v1313_v55 = vmul.f32 %v4072_v5, %v4072_v5 }
 0x414   :  { %v4075_v10 = vmul.f32 %v1256_v20, %v3620_v37  ;;  %v1311_v51 = vmul.f32 %v4069_v23, %v4069_v23 }
 0x415   :  { %v1314_v59 = vmul.f32 %v4078_v13, %v4078_v13 }
 0x416   :  { %v1289_v26 = vadd.f32 %v4075_v10, %v4069_v23  ;;  %v1312_v29 = vmul.f32 %v4075_v10, %v4075_v10  ;;  %v2967_v27 = vpop.f32.mrb[24].mxu1 }
 0x417   :  { %v1261_v50 = vmax.f32 %v2967_v27, 0.0  ;;  %v1208_v53 = vpop.f32.mrb[25].mxu1 }
 0x418   :  { %v1290_v8 = vadd.f32 %v1289_v26, %v4072_v5  ;;  %v1327_v60 = vadd.f32 %v1312_v29, %v1311_v51  ;;  %v1259_v45 = vmax.f32 %v1208_v53, 0.0  ;;  %v2968_v46 = vpop.f32.mrb[26].mxu1 }
 0x419   :  { %v1262_v56 = vmax.f32 %v2968_v46, 0.0  ;;  %v1211_v57 = vpop.f32.mrb[27].mxu1  ;;  %v4096_v43 = vmul.f32 %v1261_v50, %v3636_v49 }
 0x41a   :  { %v1328_v24 = vadd.f32 %v1327_v60, %v1313_v55  ;;  %v4092_v25 = vmul.f32 %v1259_v45, %v3624_v39  ;;  %v1291_v61 = vadd.f32 %v1290_v8, %v4078_v13  ;;  %v1260_v21 = vmax.f32 %v1211_v57, 0.0 }
 0x41b   :  { %v4105_v4 = vmul.f32 %v1262_v56, %v3648_v54  ;;  %v1317_v6 = vmul.f32 %v4096_v43, %v4096_v43 }
 0x41c   :  { %v1292_v22 = vadd.f32 %v1291_v61, %v4092_v25  ;;  %v1315_v63 = vmul.f32 %v4092_v25, %v4092_v25  ;;  %v1329_v2 = vadd.f32 %v1328_v24, %v1314_v59  ;;  %v4102_v3 = vmul.f32 %v1260_v21, %v3631_v42 }
 0x41d   :  { %v1318_v52 = vmul.f32 %v4105_v4, %v4105_v4 }
 0x41e   :  { %v1330_v31 = vadd.f32 %v1329_v2, %v1315_v63  ;;  %v1293_v12 = vadd.f32 %v1292_v22, %v4102_v3  ;;  %v1316_v17 = vmul.f32 %v4102_v3, %v4102_v3  ;;  %v2971_v16 = vpop.f32.mrb[28].mxu1 }
 0x41f   :  { %v1265_v44 = vmax.f32 %v2971_v16, 0.0  ;;  %v1224_v58 = vpop.f32.mrb[29].mxu1 }
 0x420   :  { %v1294_v7 = vadd.f32 %v1293_v12, %v4096_v43  ;;  %v1331_v9 = vadd.f32 %v1330_v31, %v1316_v17  ;;  %v1263_v41 = vmax.f32 %v1224_v58, 0.0  ;;  %v2972_v32 = vpop.f32.mrb[30].mxu1 }
 0x421   :  { %v1266_v40 = vmax.f32 %v2972_v32, 0.0  ;;  %v1227_v14 = vpop.f32.mrb[31].mxu1  ;;  %v4120_v51 = vmul.f32 %v1265_v44, %v3688_v18 }
 0x422   :  { %v1332_v19 = vadd.f32 %v1331_v9, %v1317_v6  ;;  %v4116_v0 = vmul.f32 %v1263_v41, %v3660_v62  ;;  %v1295_v47 = vadd.f32 %v1294_v7, %v4105_v4  ;;  %v1264_v20 = vmax.f32 %v1227_v14, 0.0 }
 0x423   :  { %v4129_v53 = vmul.f32 %v1266_v40, %v3698_v30  ;;  %v1321_v56 = vmul.f32 %v4120_v51, %v4120_v51 }
 0x424   :  { %v1296_v26 = vadd.f32 %v1295_v47, %v4116_v0  ;;  %v1319_v29 = vmul.f32 %v4116_v0, %v4116_v0  ;;  %v1333_v27 = vadd.f32 %v1332_v19, %v1318_v52  ;;  %v4126_v50 = vmul.f32 %v1264_v20, %v3674_v11 }
 0x425   :  { %v1322_v22 = vmul.f32 %v4129_v53, %v4129_v53 }
 0x426   :  { %v1334_v55 = vadd.f32 %v1333_v27, %v1319_v29  ;;  %v1297_v8 = vadd.f32 %v1296_v26, %v4126_v50  ;;  %v1320_v60 = vmul.f32 %v4126_v50, %v4126_v50  ;;  %v2975_v45 = vpop.f32.mrb[32].mxu1 }
 0x427   :  { %v1269_v46 = vmax.f32 %v2975_v45, 0.0  ;;  %v1240_v59 = vpop.f32.mrb[33].mxu1 }
 0x428   :  { %v1298_v57 = vadd.f32 %v1297_v8, %v4120_v51  ;;  %v1335_v24 = vadd.f32 %v1334_v55, %v1320_v60  ;;  %v1267_v61 = vmax.f32 %v1240_v59, 0.0  ;;  %v2976_v21 = vpop.f32.mrb[34].mxu1 }
 0x429   :  { %v1270_v63 = vmax.f32 %v2976_v21, 0.0  ;;  %v1243_v2 = vpop.f32.mrb[35].mxu1  ;;  %v4144_v44 = vmul.f32 %v1269_v46, %v3735_v15 }
 0x42a   :  { %v1336_v31 = vadd.f32 %v1335_v24, %v1321_v56  ;;  %v4140_v12 = vmul.f32 %v1267_v61, %v3711_v48  ;;  %v1299_v17 = vadd.f32 %v1298_v57, %v4129_v53  ;;  %v1268_v16 = vmax.f32 %v1243_v2, 0.0 }
 0x42b   :  { %v4151_v32 = vmul.f32 %v1270_v63, %v3749_v28  ;;  %v1325_v14 = vmul.f32 %v4144_v44, %v4144_v44 }
 0x42c   :  { %v1300_v58 = vadd.f32 %v1299_v17, %v4140_v12  ;;  %v1323_v6 = vmul.f32 %v4140_v12, %v4140_v12  ;;  %v1337_v7 = vadd.f32 %v1336_v31, %v1322_v22  ;;  %v1286_v9 = vmul.f32 %v1268_v16, %v3725_v1 }
 0x42d   :  { %v1326_v20 = vmul.f32 %v4151_v32, %v4151_v32 }
 0x42e   :  { %v1338_v41 = vadd.f32 %v1337_v7, %v1323_v6  ;;  %v1301_v52 = vadd.f32 %v1300_v58, %v1286_v9  ;;  %v1324_v40 = vmul.f32 %v1286_v9, %v1286_v9 }
 0x430   :  { %v1302_v19 = vadd.f32 %v1301_v52, %v4144_v44  ;;  %v1339_v47 = vadd.f32 %v1338_v41, %v1324_v40 }
 0x432   :  { %v1303_v26 = vadd.f32 %v1302_v19, %v4151_v32  ;;  %v1340_v29 = vadd.f32 %v1339_v47, %v1325_v14 }
 0x434   :  { %v1304_v27 = vrot.slane %v1303_v26, 4  ;;  %v1341_v55 = vadd.f32 %v1340_v29, %v1326_v20 }
 0x436   :  { %v1305_v8 = vadd.f32 %v1304_v27, %v1303_v26  ;;  %v1342_v60 = vrot.slane %v1341_v55, 4 }
 0x438   :  { %v1306_v45 = vrot.slane %v1305_v8, 2  ;;  %v1343_v46 = vadd.f32 %v1342_v60, %v1341_v55 }
 0x43a   :  { %v1307_v59 = vadd.f32 %v1306_v45, %v1305_v8  ;;  %v1344_v56 = vrot.slane %v1343_v46, 2 }
 0x43c   :  { %v1308_v57 = vrot.slane %v1307_v59, 1  ;;  %v1345_v24 = vadd.f32 %v1344_v56, %v1343_v46 }
 0x43e   :  { %v1309_v61 = vadd.f32 %v1308_v57, %v1307_v59  ;;  %v1346_v21 = vrot.slane %v1345_v24, 1 }
 0x440   :  { %v4159_v22 = vmul.f32 0.0625, %v1309_v61  ;;  %v1347_v63 = vadd.f32 %v1346_v21, %v1345_v24 }
 0x442   :  { %v1348_v2 = vmul.f32 0.0625, %v1347_v63  ;;  %v1349_v31 = vmul.f32 %v4159_v22, %v4159_v22  ;;  %v1365_v17 = vsub.f32 %v1286_v9, %v4159_v22  ;;  %v1352_v16 = vsub.f32 %v4069_v23, %v4159_v22 }
 0x443   :  { %v1353_v58 = vsub.f32 %v4075_v10, %v4159_v22  ;;  %v1354_v6 = vsub.f32 %v4072_v5, %v4159_v22  ;;  %v1355_v7 = vsub.f32 %v4078_v13, %v4159_v22  ;;  %v1356_v41 = vsub.f32 %v4092_v25, %v4159_v22 }
 0x444   :  { %v1350_v52 = vsub.f32 %v1348_v2, %v1349_v31  ;;  %v1357_v40 = vsub.f32 %v4102_v3, %v4159_v22  ;;  %v1358_v23 = vsub.f32 %v4096_v43, %v4159_v22  ;;  %v1359_v10 = vsub.f32 %v4105_v4, %v4159_v22 }
 0x445   :  { %v1360_v5 = vsub.f32 %v4116_v0, %v4159_v22  ;;  %v1361_v13 = vsub.f32 %v4126_v50, %v4159_v22  ;;  %v1362_v25 = vsub.f32 %v4120_v51, %v4159_v22  ;;  %v1363_v14 = vsub.f32 %v4129_v53, %v4159_v22  ;;  %v2507_v0 = vld [vmem:[%s4677_s10] ss:$0 sm:$0xff] }
 0x446   :  { %v1351_v9 = vmax.f32 %v1350_v52, 0.0  ;;  %v1364_v19 = vsub.f32 %v4140_v12, %v4159_v22  ;;  %v1366_v43 = vsub.f32 %v4144_v44, %v4159_v22  ;;  %v1367_v4 = vsub.f32 %v4151_v32, %v4159_v22  ;;  %v4202_v12 = vld [vmem:[%s4678_s11] ss:$0 sm:$0xff] }
 0x447   :  { %v1387_v50 = vmul.f32 %v2507_v0, %v1365_v17  ;;  %v1374_v51 = vmul.f32 %v2507_v0, %v1352_v16  ;;  %v1375_v47 = vmul.f32 %v2507_v0, %v1353_v58  ;;  %v1376_v20 = vmul.f32 %v2507_v0, %v1354_v6 }
 0x448   :  { %v1390_v3 = vadd.f32 1e-05, %v1351_v9  ;;  %v1377_v53 = vmul.f32 %v2507_v0, %v1355_v7  ;;  %v1378_v44 = vmul.f32 %v2507_v0, %v1356_v41  ;;  %v1379_v29 = vmul.f32 %v2507_v0, %v1357_v40 }
 0x449   :  { %v1380_v27 = vmul.f32 %v2507_v0, %v1358_v23  ;;  %v1381_v32 = vmul.f32 %v2507_v0, %v1359_v10  ;;  %v1382_v6 = vmul.f32 %v2507_v0, %v1360_v5  ;;  %v1383_v52 = vmul.f32 %v2507_v0, %v1361_v13 }
 0x44a   :  { %3423 = vrsqrt.f32 %v1390_v3  ;;  %v1384_v40 = vmul.f32 %v2507_v0, %v1362_v25 }
 0x454   :  { %v4197_v26 = vpop.eup %3423 }
 0x455   :  { %v4205_v55 = vmul.f32 %v4197_v26, %v1387_v50  ;;  %v1392_v8 = vmul.f32 %v4197_v26, %v1374_v51  ;;  %v1393_v60 = vmul.f32 %v4197_v26, %v1375_v47  ;;  %v1394_v45 = vmul.f32 %v4197_v26, %v1376_v20 }
 0x456   :  { %v1395_v46 = vmul.f32 %v4197_v26, %v1377_v53  ;;  %v1396_v59 = vmul.f32 %v4197_v26, %v1378_v44  ;;  %v1397_v56 = vmul.f32 %v4197_v26, %v1379_v29  ;;  %v1398_v57 = vmul.f32 %v4197_v26, %v1380_v27 }
 0x457   :  { %v1414_v24 = vadd.f32 %v4202_v12, %v1392_v8  ;;  %v1415_v61 = vadd.f32 %v4202_v12, %v1393_v60  ;;  %v1416_v21 = vadd.f32 %v4202_v12, %v1394_v45  ;;  %v1399_v31 = vmul.f32 %v4197_v26, %v1381_v32 }
 0x458   :  { %v1417_v22 = vadd.f32 %v4202_v12, %v1395_v46  ;;  %v1418_v63 = vadd.f32 %v4202_v12, %v1396_v59  ;;  %v1419_v2 = vadd.f32 %v4202_v12, %v1397_v56  ;;  %v1420_v25 = vadd.f32 %v4202_v12, %v1398_v57 }
 0x459   :  { %v4222_v17 = vmul.f32 %v1414_v24, %v3616_v35  ;;  %v4225_v16 = vmul.f32 %v1415_v61, %v3620_v37  ;;  %v4228_v58 = vmul.f32 %v1416_v21, %v3618_v36  ;;  %v1421_v50 = vadd.f32 %v4202_v12, %v1399_v31 }
 0x45a   :  { %v4231_v7 = vmul.f32 %v1417_v22, %v3622_v38  ;;  %v4234_v41 = vmul.f32 %v1418_v63, %v3624_v39  ;;  %v4245_v5 = vmul.f32 %v1419_v2, %v3631_v42  ;;  %v1385_v47 = vmul.f32 %v2507_v0, %v1363_v14 }
 0x45b   :  { %v4238_v9 = vpack.c.bf16 %v4225_v16, %v4222_v17  ;;  %v1516_v23 = vmul.f32 %v4222_v17, %v4222_v17  ;;  %v1517_v10 = vmul.f32 %v4225_v16, %v4225_v16  ;;  %v1518_v3 = vmul.f32 %v4228_v58, %v4228_v58 }
 0x45c   :  { %v1519_v13 = vmul.f32 %v4231_v7, %v4231_v7  ;;  %v1386_v20 = vmul.f32 %v2507_v0, %v1364_v19  ;;  %v1400_v53 = vmul.f32 %v4197_v26, %v1382_v6  ;;  %v1401_v44 = vmul.f32 %v4197_v26, %v1383_v52 }
 0x45d   :  { %3263 = vmatpush3.bf16.msra.mxu0 %v4238_v9  ;;  %v3286_v51 = vpack.c.bf16 %v1517_v10, %v1516_v23  ;;  %v1402_v29 = vmul.f32 %v4197_v26, %v1384_v40  ;;  %v1388_v27 = vmul.f32 %v2507_v0, %v1366_v43  ;;  %v4260_v32 = vpack.c.bf16 %v4231_v7, %v4228_v58 }
 0x45e   :  { %3264 = vmatprep.subr.bf16.mxu0 %v3441_v33  ;;  %v1520_v8 = vmul.f32 %v4234_v41, %v4234_v41  ;;  %v1521_v14 = vmul.f32 %v4245_v5, %v4245_v5  ;;  %v1389_v19 = vmul.f32 %v2507_v0, %v1367_v4  ;;  %v3289_v60 = vpack.c.bf16 %v1519_v13, %v1518_v3 }
 0x45f   :  { %3287 = vmatpush3.bf16.msra.mxu1 %v3286_v51  ;;  %v4268_v45 = vmul.f32 %v1420_v25, %v3636_v49  ;;  %v4271_v43 = vmul.f32 %v1421_v50, %v3648_v54  ;;  %v1403_v46 = vmul.f32 %v4197_v26, %v1385_v47  ;;  %v1422_v59 = vadd.f32 %v4202_v12, %v1400_v53 }
 0x460   :  { %3288 = vmatprep.subr.bf16.mxu1 %v3441_v33  ;;  %v1423_v56 = vadd.f32 %v4202_v12, %v1401_v44  ;;  %v1404_v57 = vmul.f32 %v4197_v26, %v1386_v20  ;;  %v1406_v4 = vmul.f32 %v4197_v26, %v1388_v27  ;;  %v4282_v0 = vpack.c.bf16 %v4245_v5, %v4234_v41 }
 0x461   :  { %3266 = vmatpush3.bf16.msra.mxu0 %v4260_v32  ;;  %v1407_v24 = vmul.f32 %v4197_v26, %v1389_v19  ;;  %v1522_v61 = vmul.f32 %v4268_v45, %v4268_v45  ;;  %v1523_v21 = vmul.f32 %v4271_v43, %v4271_v43  ;;  %v1424_v22 = vadd.f32 %v4202_v12, %v1402_v29 }
 0x462   :  { %3267 = vmatprep.subr.bf16.mxu0 %v3441_v33  ;;  %v3292_v63 = vpack.c.bf16 %v1521_v14, %v1520_v8  ;;  %v4293_v2 = vmul.f32 %v1422_v59, %v3660_v62  ;;  %v4296_v31 = vmul.f32 %v1423_v56, %v3674_v11  ;;  %v1425_v26 = vadd.f32 %v4202_v12, %v1403_v46 }
 0x463   :  { %3290 = vmatpush3.bf16.msra.mxu1 %v3289_v60  ;;  %v3271_v6 = vpack.c.bf16 %v4271_v43, %v4268_v45  ;;  %v1427_v52 = vadd.f32 %v4202_v12, %v4205_v55  ;;  %v3295_v40 = vpack.c.bf16 %v1523_v21, %v1522_v61  ;;  %v4306_v23 = vmul.f32 %v1424_v22, %v3688_v18  ;;  %v4362_v61 = vld [vmem:[%s4672_s2] sm:$0xff] }
 0x464   :  { %3291 = vmatprep.subr.bf16.mxu1 %v3441_v33  ;;  %v1524_v10 = vmul.f32 %v4293_v2, %v4293_v2  ;;  %v1525_v3 = vmul.f32 %v4296_v31, %v4296_v31  ;;  %v4313_v13 = vmul.f32 %v1425_v26, %v3698_v30  ;;  %v1426_v25 = vadd.f32 %v4202_v12, %v1404_v57  ;;  %v3432_v21 = vld [vmem:[%s4669_s1] sm:$0xff]   ;;  %v3438_v26 = vld [vmem:[%s4669_s1 + $0x30] sm:$0xff]  }
 0x465   :  { %3269 = vmatpush3.bf16.msra.mxu0 %v4282_v0  ;;  %v3274_v55 = vpack.c.bf16 %v4296_v31, %v4293_v2  ;;  %v1526_v50 = vmul.f32 %v4306_v23, %v4306_v23  ;;  %v4323_v51 = vmul.f32 %v1427_v52, %v3725_v1  ;;  %v1428_v47 = vadd.f32 %v4202_v12, %v1406_v4  ;;  %v3436_v22 = vld [vmem:[%s4669_s1 + $0x20] sm:$0xff]  }
 0x466   :  { %3270 = vmatprep.subr.bf16.mxu0 %v3441_v33  ;;  %v3298_v20 = vpack.c.bf16 %v1525_v3, %v1524_v10  ;;  %v1527_v53 = vmul.f32 %v4313_v13, %v4313_v13  ;;  %v4329_v44 = vmul.f32 %v1426_v25, %v3711_v48  ;;  %v1429_v29 = vadd.f32 %v4202_v12, %v1407_v24  ;;  %v3403_v52 = vld [vmem:[%s4673_s8 + $0x40] sm:$0xff]   ;;  %v3405_v10 = vld [vmem:[%s4673_s8 + $0x50] sm:$0xff]   ;;  %v3406_v3 = vld [vmem:[%s4673_s8 + $0x58] sm:$0xff]  }
 0x467   :  { %3293 = vmatpush3.bf16.msra.mxu1 %v3292_v63  ;;  %v3277_v27 = vpack.c.bf16 %v4313_v13, %v4306_v23  ;;  %v1529_v8 = vmul.f32 %v4323_v51, %v4323_v51  ;;  %v4341_v60 = vmul.f32 %v1428_v47, %v3735_v15  ;;  %v3437_v63 = vld [vmem:[%s4669_s1 + $0x28] sm:$0xff]   ;;  %v3407_v25 = vld [vmem:[%s4673_s8 + $0x60] sm:$0xff]   ;;  %v3410_v47 = vld [vmem:[%s4673_s8 + $0x78] sm:$0xff]  }
 0x468   :  { %3294 = vmatprep.subr.bf16.mxu1 %v3441_v33  ;;  %v3301_v14 = vpack.c.bf16 %v1527_v53, %v1526_v50  ;;  %v1528_v19 = vmul.f32 %v4329_v44, %v4329_v44  ;;  %v4344_v12 = vmul.f32 %v1429_v29, %v3749_v28  ;;  %v3280_v46 = vpack.c.bf16 %v4323_v51, %v4329_v44  ;;  %v3409_v50 = vld [vmem:[%s4673_s8 + $0x70] sm:$0xff]   ;;  %v3412_v53 = vld [vmem:[%s4674_s9 + $0x48] sm:$0xff]  }
 0x469   :  { %3272 = vmatpush3.bf16.msra.mxu0 %v3271_v6  ;;  %v1530_v56 = vmul.f32 %v4341_v60, %v4341_v60  ;;  %v3413_v29 = vld [vmem:[%s4674_s9 + $0x50] sm:$0xff]  }
 0x46a   :  { %3273 = vmatprep.subr.bf16.mxu0 %v3441_v33  ;;  %v3304_v59 = vpack.c.bf16 %v1529_v8, %v1528_v19  ;;  %v1531_v57 = vmul.f32 %v4344_v12, %v4344_v12  ;;  %v3283_v4 = vpack.c.bf16 %v4344_v12, %v4341_v60  ;;  %v3415_v8 = vld [vmem:[%s4674_s9 + $0x60] sm:$0xff]  }
 0x46b   :  { %3296 = vmatpush3.bf16.msra.mxu1 %v3295_v40  ;;  %v3404_v40 = vld [vmem:[%s4673_s8 + $0x48] sm:$0xff]  }
 0x46c   :  { %3297 = vmatprep.subr.bf16.mxu1 %v3441_v33  ;;  %v3307_v24 = vpack.c.bf16 %v1531_v57, %v1530_v56 }
 0x46d   :  { %3275 = vmatpush3.bf16.msra.mxu0 %v3274_v55 }
 0x46e   :  { %3276 = vmatprep.subr.bf16.mxu0 %v3441_v33 }
 0x46f   :  { %3299 = vmatpush3.bf16.msra.mxu1 %v3298_v20  ;;  %v3411_v20 = vld [vmem:[%s4674_s9 + $0x40] sm:$0xff]  }
 0x470   :  { %3300 = vmatprep.subr.bf16.mxu1 %v3441_v33 }
 0x471   :  { %3278 = vmatpush3.bf16.msra.mxu0 %v3277_v27 }
 0x472   :  { %3279 = vmatprep.subr.bf16.mxu0 %v3441_v33 }
 0x473   :  { %3302 = vmatpush3.bf16.msra.mxu1 %v3301_v14  ;;  %v3416_v14 = vld [vmem:[%s4674_s9 + $0x68] sm:$0xff]  }
 0x474   :  { %3303 = vmatprep.subr.bf16.mxu1 %v3441_v33 }
 0x475   :  { %3281 = vmatpush3.bf16.msra.mxu0 %v3280_v46 }
 0x476   :  { %3282 = vmatprep.subr.bf16.mxu0 %v3441_v33 }
 0x477   :  { %3305 = vmatpush3.bf16.msra.mxu1 %v3304_v59 }
 0x478   :  { %3306 = vmatprep.subr.bf16.mxu1 %v3441_v33 }
 0x479   :  { %3284 = vmatpush3.bf16.msra.mxu0 %v3283_v4 }
 0x47a   :  { %3047 = vmatprep.subr.bf16.mxu0 %v4238_v9 }
 0x47b   :  { %3308 = vmatpush3.bf16.msra.mxu1 %v3307_v24 }
 0x47c   :  { %3010 = vmatmul.mubr.f32.vlgmr.msra.gmra.mrb[18].mxu0 %v4362_v61  ;;  %3079 = vmatprep.subr.bf16.mxu1 %v3403_v52 }
 0x47d   :  { %3048 = vmatpush3.bf16.msra.mxu0 %v4238_v9  ;;  %3063 = vmatprep.mubr.bf16.mxu0 %v3432_v21  ;;  %v3433_v9 = vld [vmem:[%s4669_s1 + $0x8] sm:$0xff]  }
 0x47e   :  { %3045 = vmatmul.mubr.f32.vlgmr.msra.gmra.mrb[2].mxu1 %v4362_v61  ;;  %3049 = vmatprep.subr.bf16.mxu0 %v4260_v32 }
 0x47f   :  { %3080 = vmatpush3.bf16.msra.mxu1 %v3403_v52 }
 0x480   :  { %3081 = vmatprep.subr.bf16.mxu1 %v3404_v40 }
 0x481   :  { %3050 = vmatpush3.bf16.msra.mxu0 %v4260_v32  ;;  %v3434_v32 = vld [vmem:[%s4669_s1 + $0x10] sm:$0xff]  }
 0x482   :  { %3051 = vmatprep.subr.bf16.mxu0 %v4282_v0 }
 0x483   :  { %3082 = vmatpush3.bf16.msra.mxu1 %v3404_v40 }
 0x484   :  { %3083 = vmatprep.subr.bf16.mxu1 %v3405_v10 }
 0x485   :  { %3052 = vmatpush3.bf16.msra.mxu0 %v4282_v0  ;;  %v3435_v0 = vld [vmem:[%s4669_s1 + $0x18] sm:$0xff]  }
 0x486   :  { %3053 = vmatprep.subr.bf16.mxu0 %v3271_v6 }
 0x487   :  { %3084 = vmatpush3.bf16.msra.mxu1 %v3405_v10 }
 0x488   :  { %3085 = vmatprep.subr.bf16.mxu1 %v3406_v3 }
 0x489   :  { %3054 = vmatpush3.bf16.msra.mxu0 %v3271_v6  ;;  %v3439_v6 = vld [vmem:[%s4669_s1 + $0x38] sm:$0xff]  }
 0x48a   :  { %3055 = vmatprep.subr.bf16.mxu0 %v3274_v55 }
 0x48b   :  { %3086 = vmatpush3.bf16.msra.mxu1 %v3406_v3 }
 0x48c   :  { %3087 = vmatprep.subr.bf16.mxu1 %v3407_v25 }
 0x48d   :  { %3056 = vmatpush3.bf16.msra.mxu0 %v3274_v55  ;;  %v3408_v55 = vld [vmem:[%s4673_s8 + $0x68] sm:$0xff]  }
 0x48e   :  { %3057 = vmatprep.subr.bf16.mxu0 %v3277_v27 }
 0x48f   :  { %3088 = vmatpush3.bf16.msra.mxu1 %v3407_v25 }
 0x490   :  { %3089 = vmatprep.subr.bf16.mxu1 %v3408_v55 }
 0x491   :  { %3058 = vmatpush3.bf16.msra.mxu0 %v3277_v27  ;;  %v3414_v27 = vld [vmem:[%s4674_s9 + $0x58] sm:$0xff]  }
 0x492   :  { %3059 = vmatprep.subr.bf16.mxu0 %v3280_v46 }
 0x493   :  { %3090 = vmatpush3.bf16.msra.mxu1 %v3408_v55 }
 0x494   :  { %3091 = vmatprep.subr.bf16.mxu1 %v3409_v50 }
 0x495   :  { %3060 = vmatpush3.bf16.msra.mxu0 %v3280_v46 }
 0x496   :  { %3061 = vmatprep.subr.bf16.mxu0 %v3283_v4 }
 0x497   :  { %3092 = vmatpush3.bf16.msra.mxu1 %v3409_v50 }
 0x498   :  { %3093 = vmatprep.subr.bf16.mxu1 %v3410_v47 }
 0x499   :  { %3062 = vmatpush3.bf16.msra.mxu0 %v3283_v4 }
 0x49a   :  { %3111 = vmatprep.subr.bf16.mxu0 %v3411_v20 }
 0x49b   :  { %3094 = vmatpush3.bf16.msra.mxu1 %v3410_v47 }
 0x49c   :  { %3064 = vmatmul.mubr.bf16.vlgmr.msra.gmra.mrb[36].mxu0 %v3433_v9  ;;  %3309 = vmatprep.subr.bf16.mxu1 %v3441_v33 }
 0x49d   :  { %3067 = vmatprep.mubr.bf16.mxu0 %v3434_v32  ;;  %3112 = vmatpush3.bf16.msra.mxu0 %v3411_v20 }
 0x49e   :  { %3113 = vmatprep.subr.bf16.mxu0 %v3412_v53 }
 0x4a1   :  { %3114 = vmatpush3.bf16.msra.mxu0 %v3412_v53 }
 0x4a2   :  { %3115 = vmatprep.subr.bf16.mxu0 %v3413_v29 }
 0x4a4   :  { %3068 = vmatmul.mubr.bf16.gmra.mrb[40].mxu0 %v3435_v0 }
 0x4a5   :  { %3071 = vmatprep.mubr.bf16.mxu0 %v3436_v22  ;;  %3116 = vmatpush3.bf16.msra.mxu0 %v3413_v29 }
 0x4a6   :  { %3117 = vmatprep.subr.bf16.mxu0 %v3414_v27 }
 0x4a9   :  { %3118 = vmatpush3.bf16.msra.mxu0 %v3414_v27 }
 0x4aa   :  { %3119 = vmatprep.subr.bf16.mxu0 %v3415_v8 }
 0x4ac   :  { %3072 = vmatmul.mubr.bf16.gmra.mrb[44].mxu0 %v3437_v63 }
 0x4ad   :  { %3075 = vmatprep.mubr.bf16.mxu0 %v3438_v26  ;;  %3120 = vmatpush3.bf16.msra.mxu0 %v3415_v8 }
 0x4ae   :  { %3121 = vmatprep.subr.bf16.mxu0 %v3416_v14 }
 0x4b1   :  { %3122 = vmatpush3.bf16.msra.mxu0 %v3416_v14 }
 0x4b4   :  { %3076 = vmatmul.mubr.bf16.gmra.mrb[48].mxu0 %v3439_v6 }
 0x54f   :  { %v1512_v19 = vpop.f32.mrb[18].mxu0 }
 0x550   :  { %v1602_v46 = vmul.f32 %v1512_v19, %v1512_v19  ;;  %2510 = vst [vmem:[%s4675_s12 + $0x8] sm:$0xff] %v1512_v19  ;;  %v3011_v59 = vpop.f32.mrb[19].mxu0 }
 0x551   :  { %v1598_v56 = vpop.f32.mrb[2].mxu1 }
 0x552   :  { %v1603_v57 = vsub.f32 %v1598_v56, %v1602_v46  ;;  %v3046_v4 = vpop.f32.mrb[3].mxu1 }
 0x554   :  { %v1604_v24 = vmax.f32 %v1603_v57, 0.0 }
 0x556   :  { %3425 = vrsqrt.f32 %v1604_v24  ;;  %vm1607_vm3 = vcmp.eq.f32.partialorder %v1604_v24, inf  ;;  %v1610_v32 = vand.u32 2147483648, %v1604_v24  ;;  %vm1609_vm4 = vcmp.eq.f32.partialorder %v1604_v24, 0.0 }
 0x560   :  { %v3426_v21 = vpop.eup %3425 }
 0x561   :  { %v1606_v9 = vmul.f32 %v3426_v21, %v1604_v24 }
 0x563   :  { %v1608_v0 = vsel %vm1607_vm3, %v1604_v24, %v1606_v9 }
 0x564   :  { %v1611_v22 = vsel %vm1609_vm4, %v1610_v32, %v1608_v0 }
 0x565   :  { %2509 = vst [vmem:[%s4676_s13 + $0x8] sm:$0xff] %v1611_v22 }
 0x56f   :  { %v3065_v63 = vpop.f32.mrb[36].mxu0 }
 0x570   :  { %v1658_v26 = vpop.f32.mrb[37].mxu0  ;;  %v1723_v52 = vadd.f32 %v3065_v63, %v4228_v58 }
 0x571   :  { %v3066_v6 = vpop.f32.mrb[38].mxu0  ;;  %v1721_v3 = vadd.f32 %v1658_v26, %v4222_v17 }
 0x572   :  { %v1724_v40 = vadd.f32 %v3066_v6, %v4231_v7  ;;  %v1661_v10 = vpop.f32.mrb[39].mxu0 }
 0x573   :  { %v1722_v25 = vadd.f32 %v1661_v10, %v4225_v16 }
 0x574   :  { %v1738_v55 = vpack.c.bf16 %v1724_v40, %v1723_v52 }
 0x575   :  { %v1737_v50 = vpack.c.bf16 %v1722_v25, %v1721_v3 }
 0x577   :  { %v3069_v47 = vpop.f32.mrb[40].mxu0  ;;  %3095 = vmatprep.mubr.bf16.mxu1 %v1737_v50 }
 0x578   :  { %v1674_v20 = vpop.f32.mrb[41].mxu0  ;;  %3096 = vmatmul.mubr.bf16.vlgmr.msra.gmra.mrb[36].mxu1 %v1738_v55  ;;  %v1727_v29 = vadd.f32 %v3069_v47, %v4268_v45 }
 0x579   :  { %v3070_v53 = vpop.f32.mrb[42].mxu0  ;;  %v1725_v58 = vadd.f32 %v1674_v20, %v4234_v41 }
 0x57a   :  { %v1728_v27 = vadd.f32 %v3070_v53, %v4271_v43  ;;  %v1677_v8 = vpop.f32.mrb[43].mxu0 }
 0x57b   :  { %v1726_v7 = vadd.f32 %v1677_v8, %v4245_v5 }
 0x57c   :  { %v1740_v14 = vpack.c.bf16 %v1728_v27, %v1727_v29 }
 0x57d   :  { %v1739_v17 = vpack.c.bf16 %v1726_v7, %v1725_v58 }
 0x57f   :  { %v3073_v19 = vpop.f32.mrb[44].mxu0  ;;  %3099 = vmatprep.mubr.bf16.mxu1 %v1739_v17 }
 0x580   :  { %v1690_v16 = vpop.f32.mrb[45].mxu0  ;;  %3100 = vmatmul.mubr.bf16.gmra.mrb[40].mxu1 %v1740_v14  ;;  %v1731_v59 = vadd.f32 %v3073_v19, %v4306_v23 }
 0x581   :  { %v3074_v46 = vpop.f32.mrb[46].mxu0  ;;  %v1729_v45 = vadd.f32 %v1690_v16, %v4293_v2 }
 0x582   :  { %v1732_v56 = vadd.f32 %v3074_v46, %v4313_v13  ;;  %v1693_v57 = vpop.f32.mrb[47].mxu0 }
 0x583   :  { %v1730_v43 = vadd.f32 %v1693_v57, %v4296_v31  ;;  %v3417_v31 = vld [vmem:[%s4674_s9 + $0x70] sm:$0xff]  }
 0x584   :  { %v1742_v4 = vpack.c.bf16 %v1732_v56, %v1731_v59  ;;  %3123 = vmatprep.subr.bf16.mxu0 %v3417_v31 }
 0x585   :  { %v1741_v41 = vpack.c.bf16 %v1730_v43, %v1729_v45  ;;  %3124 = vmatpush3.bf16.msra.mxu0 %v3417_v31 }
 0x587   :  { %v3077_v24 = vpop.f32.mrb[48].mxu0  ;;  %3103 = vmatprep.mubr.bf16.mxu1 %v1741_v41 }
 0x588   :  { %v1706_v5 = vpop.f32.mrb[49].mxu0  ;;  %3104 = vmatmul.mubr.bf16.gmra.mrb[44].mxu1 %v1742_v4  ;;  %v1735_v9 = vadd.f32 %v3077_v24, %v4341_v60  ;;  %v3418_v60 = vld [vmem:[%s4674_s9 + $0x78] sm:$0xff]  }
 0x589   :  { %v3078_v21 = vpop.f32.mrb[50].mxu0  ;;  %v1733_v23 = vadd.f32 %v1706_v5, %v4329_v44  ;;  %3125 = vmatprep.subr.bf16.mxu0 %v3418_v60 }
 0x58a   :  { %v1736_v32 = vadd.f32 %v3078_v21, %v4344_v12  ;;  %v1709_v0 = vpop.f32.mrb[51].mxu0  ;;  %3126 = vmatpush3.bf16.msra.mxu0 %v3418_v60 }
 0x58b   :  { %v1734_v13 = vadd.f32 %v1709_v0, %v4323_v51  ;;  %3333 = vmatprep.subr.bf16.mxu0 %v3441_v33 }
 0x58c   :  { %v1744_v22 = vpack.c.bf16 %v1736_v32, %v1735_v9 }
 0x58d   :  { %v1743_v2 = vpack.c.bf16 %v1734_v13, %v1733_v23 }
 0x58f   :  { %3107 = vmatprep.mubr.bf16.mxu1 %v1743_v2 }
 0x590   :  { %3108 = vmatmul.mubr.bf16.gmra.mrb[48].mxu1 %v1744_v22 }
 0x591   :  { %3175 = vmatprep.mubr.msk.f32.mxu1 %vm3442_vm0, %v3443_v34 }
 0x64b   :  { %v3097_v51 = vpop.f32.mrb[36].mxu1 }
 0x64c   :  { %v1844_v44 = vpop.f32.mrb[37].mxu1  ;;  %v1909_v63 = vmax.f32 %v3097_v51, 0.0 }
 0x64d   :  { %v3098_v12 = vpop.f32.mrb[38].mxu1  ;;  %v1907_v52 = vmax.f32 %v1844_v44, 0.0 }
 0x64e   :  { %v1910_v26 = vmax.f32 %v3098_v12, 0.0  ;;  %v1847_v6 = vpop.f32.mrb[39].mxu1 }
 0x64f   :  { %v1908_v40 = vmax.f32 %v1847_v6, 0.0 }
 0x650   :  { %v1924_v10 = vpack.c.bf16 %v1910_v26, %v1909_v63 }
 0x651   :  { %v1923_v3 = vpack.c.bf16 %v1908_v40, %v1907_v52 }
 0x653   :  { %v3101_v25 = vpop.f32.mrb[40].mxu1  ;;  %3127 = vmatprep.mubr.bf16.mxu0 %v1923_v3 }
 0x654   :  { %v1860_v55 = vpop.f32.mrb[41].mxu1  ;;  %3128 = vmatmul.mubr.bf16.vlgmr.msra.gmra.mrb[52].mxu0 %v1924_v10  ;;  %v1913_v47 = vmax.f32 %v3101_v25, 0.0 }
 0x655   :  { %v3102_v50 = vpop.f32.mrb[42].mxu1  ;;  %v1911_v29 = vmax.f32 %v1860_v55, 0.0 }
 0x656   :  { %v1914_v20 = vmax.f32 %v3102_v50, 0.0  ;;  %v1863_v53 = vpop.f32.mrb[43].mxu1 }
 0x657   :  { %v1912_v27 = vmax.f32 %v1863_v53, 0.0 }
 0x658   :  { %v1926_v8 = vpack.c.bf16 %v1914_v20, %v1913_v47 }
 0x659   :  { %v1925_v58 = vpack.c.bf16 %v1912_v27, %v1911_v29 }
 0x65b   :  { %v3105_v7 = vpop.f32.mrb[44].mxu1  ;;  %3131 = vmatprep.mubr.bf16.mxu0 %v1925_v58 }
 0x65c   :  { %v1876_v14 = vpop.f32.mrb[45].mxu1  ;;  %3132 = vmatmul.mubr.bf16.gmra.mrb[56].mxu0 %v1926_v8  ;;  %v1917_v19 = vmax.f32 %v3105_v7, 0.0 }
 0x65d   :  { %v3106_v17 = vpop.f32.mrb[46].mxu1  ;;  %v1915_v59 = vmax.f32 %v1876_v14, 0.0 }
 0x65e   :  { %v1918_v16 = vmax.f32 %v3106_v17, 0.0  ;;  %v1879_v46 = vpop.f32.mrb[47].mxu1 }
 0x65f   :  { %v1916_v56 = vmax.f32 %v1879_v46, 0.0 }
 0x660   :  { %v1928_v57 = vpack.c.bf16 %v1918_v16, %v1917_v19 }
 0x661   :  { %v1927_v45 = vpack.c.bf16 %v1916_v56, %v1915_v59 }
 0x663   :  { %v3109_v43 = vpop.f32.mrb[48].mxu1  ;;  %3135 = vmatprep.mubr.bf16.mxu0 %v1927_v45 }
 0x664   :  { %v1892_v4 = vpop.f32.mrb[49].mxu1  ;;  %3136 = vmatmul.mubr.bf16.gmra.mrb[60].mxu0 %v1928_v57  ;;  %v1921_v24 = vmax.f32 %v3109_v43, 0.0 }
 0x665   :  { %v3110_v41 = vpop.f32.mrb[50].mxu1  ;;  %v1919_v9 = vmax.f32 %v1892_v4, 0.0 }
 0x666   :  { %v1922_v5 = vmax.f32 %v3110_v41, 0.0  ;;  %v1895_v21 = vpop.f32.mrb[51].mxu1 }
 0x667   :  { %v1920_v32 = vmax.f32 %v1895_v21, 0.0 }
 0x668   :  { %v1930_v0 = vpack.c.bf16 %v1922_v5, %v1921_v24 }
 0x669   :  { %v1929_v23 = vpack.c.bf16 %v1920_v32, %v1919_v9 }
 0x66b   :  { %3139 = vmatprep.mubr.bf16.mxu0 %v1929_v23 }
 0x66c   :  { %3140 = vmatmul.mubr.bf16.gmra.mrb[64].mxu0 %v1930_v0 }
 0x66d   :  { %3210 = vmatprep.mubr.msk.f32.mxu0 %vm3442_vm0, %v3443_v34 }
 0x727   :  { %v3129_v13 = vpop.f32.mrb[52].mxu0 }
 0x728   :  { %v2030_v22 = vpop.f32.mrb[53].mxu0  ;;  %v2095_v2 = vmax.f32 %v3129_v13, 0.0 }
 0x729   :  { %v2093_v31 = vmax.f32 %v2030_v22, 0.0  ;;  %v3130_v60 = vpop.f32.mrb[54].mxu0 }
 0x72a   :  { %v2096_v51 = vmax.f32 %v3130_v60, 0.0  ;;  %v2033_v44 = vpop.f32.mrb[55].mxu0  ;;  %v4475_v26 = vmul.f32 %v2095_v2, %v3618_v36 }
 0x72b   :  { %v4472_v12 = vmul.f32 %v2093_v31, %v3616_v35  ;;  %v2094_v63 = vmax.f32 %v2033_v44, 0.0 }
 0x72c   :  { %v4481_v52 = vmul.f32 %v2096_v51, %v3622_v38  ;;  %v2153_v50 = vmul.f32 %v4475_v26, %v4475_v26 }
 0x72d   :  { %v4478_v6 = vmul.f32 %v2094_v63, %v3620_v37  ;;  %v2151_v34 = vmul.f32 %v4472_v12, %v4472_v12 }
 0x72e   :  { %v2154_v27 = vmul.f32 %v4481_v52, %v4481_v52 }
 0x72f   :  { %v2129_v40 = vadd.f32 %v4478_v6, %v4472_v12  ;;  %v2152_v10 = vmul.f32 %v4478_v6, %v4478_v6  ;;  %v3133_v3 = vpop.f32.mrb[56].mxu0 }
 0x730   :  { %v2099_v25 = vmax.f32 %v3133_v3, 0.0  ;;  %v2046_v55 = vpop.f32.mrb[57].mxu0 }
 0x731   :  { %v2130_v47 = vadd.f32 %v2129_v40, %v4475_v26  ;;  %v2167_v20 = vadd.f32 %v2152_v10, %v2151_v34  ;;  %v2097_v53 = vmax.f32 %v2046_v55, 0.0  ;;  %v3134_v29 = vpop.f32.mrb[58].mxu0 }
 0x732   :  { %v2100_v8 = vmax.f32 %v3134_v29, 0.0  ;;  %v2049_v58 = vpop.f32.mrb[59].mxu0  ;;  %v4499_v16 = vmul.f32 %v2099_v25, %v3636_v49 }
 0x733   :  { %v2168_v7 = vadd.f32 %v2167_v20, %v2153_v50  ;;  %v4495_v14 = vmul.f32 %v2097_v53, %v3624_v39  ;;  %v2131_v17 = vadd.f32 %v2130_v47, %v4481_v52  ;;  %v2098_v19 = vmax.f32 %v2049_v58, 0.0 }
 0x734   :  { %v4508_v45 = vmul.f32 %v2100_v8, %v3648_v54  ;;  %v2157_v9 = vmul.f32 %v4499_v16, %v4499_v16 }
 0x735   :  { %v2132_v46 = vadd.f32 %v2131_v17, %v4495_v14  ;;  %v2155_v59 = vmul.f32 %v4495_v14, %v4495_v14  ;;  %v2169_v56 = vadd.f32 %v2168_v7, %v2154_v27  ;;  %v4505_v57 = vmul.f32 %v2098_v19, %v3631_v42 }
 0x736   :  { %v2158_v22 = vmul.f32 %v4508_v45, %v4508_v45 }
 0x737   :  { %v2170_v43 = vadd.f32 %v2169_v56, %v2155_v59  ;;  %v2133_v4 = vadd.f32 %v2132_v46, %v4505_v57  ;;  %v2156_v41 = vmul.f32 %v4505_v57, %v4505_v57  ;;  %v3137_v24 = vpop.f32.mrb[60].mxu0 }
 0x738   :  { %v2103_v5 = vmax.f32 %v3137_v24, 0.0  ;;  %v2062_v21 = vpop.f32.mrb[61].mxu0 }
 0x739   :  { %v2134_v32 = vadd.f32 %v2133_v4, %v4499_v16  ;;  %v2171_v0 = vadd.f32 %v2170_v43, %v2156_v41  ;;  %v2101_v23 = vmax.f32 %v2062_v21, 0.0  ;;  %v3138_v13 = vpop.f32.mrb[62].mxu0 }
 0x73a   :  { %v2104_v2 = vmax.f32 %v3138_v13, 0.0  ;;  %v2065_v31 = vpop.f32.mrb[63].mxu0  ;;  %v4523_v34 = vmul.f32 %v2103_v5, %v3688_v18 }
 0x73b   :  { %v2172_v60 = vadd.f32 %v2171_v0, %v2157_v9  ;;  %v4519_v51 = vmul.f32 %v2101_v23, %v3660_v62  ;;  %v2135_v44 = vadd.f32 %v2134_v32, %v4508_v45  ;;  %v2102_v63 = vmax.f32 %v2065_v31, 0.0 }
 0x73c   :  { %v4532_v55 = vmul.f32 %v2104_v2, %v3698_v30  ;;  %v2161_v8 = vmul.f32 %v4523_v34, %v4523_v34 }
 0x73d   :  { %v2136_v40 = vadd.f32 %v2135_v44, %v4519_v51  ;;  %v2159_v10 = vmul.f32 %v4519_v51, %v4519_v51  ;;  %v2173_v3 = vadd.f32 %v2172_v60, %v2158_v22  ;;  %v4529_v25 = vmul.f32 %v2102_v63, %v3674_v11 }
 0x73e   :  { %v2162_v46 = vmul.f32 %v4532_v55, %v4532_v55 }
 0x73f   :  { %v2174_v50 = vadd.f32 %v2173_v3, %v2159_v10  ;;  %v2137_v47 = vadd.f32 %v2136_v40, %v4529_v25  ;;  %v2160_v20 = vmul.f32 %v4529_v25, %v4529_v25  ;;  %v3141_v53 = vpop.f32.mrb[64].mxu0 }
 0x740   :  { %v2107_v29 = vmax.f32 %v3141_v53, 0.0  ;;  %v2078_v27 = vpop.f32.mrb[65].mxu0 }
 0x741   :  { %v2138_v58 = vadd.f32 %v2137_v47, %v4523_v34  ;;  %v2175_v7 = vadd.f32 %v2174_v50, %v2160_v20  ;;  %v2105_v17 = vmax.f32 %v2078_v27, 0.0  ;;  %v3142_v19 = vpop.f32.mrb[66].mxu0 }
 0x742   :  { %v2108_v59 = vmax.f32 %v3142_v19, 0.0  ;;  %v2081_v56 = vpop.f32.mrb[67].mxu0  ;;  %v4547_v5 = vmul.f32 %v2107_v29, %v3735_v15 }
 0x743   :  { %v2176_v43 = vadd.f32 %v2175_v7, %v2161_v8  ;;  %v4543_v4 = vmul.f32 %v2105_v17, %v3711_v48  ;;  %v2139_v41 = vadd.f32 %v2138_v58, %v4532_v55  ;;  %v2106_v24 = vmax.f32 %v2081_v56, 0.0 }
 0x744   :  { %v4554_v13 = vmul.f32 %v2108_v59, %v3749_v28  ;;  %v2165_v31 = vmul.f32 %v4547_v5, %v4547_v5 }
 0x745   :  { %v2140_v21 = vadd.f32 %v2139_v41, %v4543_v4  ;;  %v2163_v9 = vmul.f32 %v4543_v4, %v4543_v4  ;;  %v2177_v32 = vadd.f32 %v2176_v43, %v2162_v46  ;;  %v2126_v0 = vmul.f32 %v2106_v24, %v3725_v1 }
 0x746   :  { %v2166_v63 = vmul.f32 %v4554_v13, %v4554_v13 }
 0x747   :  { %v2178_v23 = vadd.f32 %v2177_v32, %v2163_v9  ;;  %v2141_v22 = vadd.f32 %v2140_v21, %v2126_v0  ;;  %v2164_v2 = vmul.f32 %v2126_v0, %v2126_v0 }
 0x749   :  { %v2142_v60 = vadd.f32 %v2141_v22, %v4547_v5  ;;  %v2179_v44 = vadd.f32 %v2178_v23, %v2164_v2 }
 0x74b   :  { %v2143_v40 = vadd.f32 %v2142_v60, %v4554_v13  ;;  %v2180_v10 = vadd.f32 %v2179_v44, %v2165_v31 }
 0x74d   :  { %v2144_v3 = vrot.slane %v2143_v40, 4  ;;  %v2181_v50 = vadd.f32 %v2180_v10, %v2166_v63 }
 0x74f   :  { %v2145_v47 = vadd.f32 %v2144_v3, %v2143_v40  ;;  %v2182_v20 = vrot.slane %v2181_v50, 4 }
 0x751   :  { %v2146_v53 = vrot.slane %v2145_v47, 2  ;;  %v2183_v29 = vadd.f32 %v2182_v20, %v2181_v50 }
 0x753   :  { %v2147_v27 = vadd.f32 %v2146_v53, %v2145_v47  ;;  %v2184_v8 = vrot.slane %v2183_v29, 2 }
 0x755   :  { %v2148_v58 = vrot.slane %v2147_v27, 1  ;;  %v2185_v7 = vadd.f32 %v2184_v8, %v2183_v29 }
 0x757   :  { %v2149_v17 = vadd.f32 %v2148_v58, %v2147_v27  ;;  %v2186_v19 = vrot.slane %v2185_v7, 1 }
 0x759   :  { %v2150_v46 = vmul.f32 0.0625, %v2149_v17  ;;  %v2187_v59 = vadd.f32 %v2186_v19, %v2185_v7 }
 0x75b   :  { %v2188_v56 = vmul.f32 0.0625, %v2187_v59  ;;  %v2189_v43 = vmul.f32 %v2150_v46, %v2150_v46  ;;  %v2205_v41 = vsub.f32 %v2126_v0, %v2150_v46  ;;  %v2192_v24 = vsub.f32 %v4472_v12, %v2150_v46 }
 0x75c   :  { %v2193_v21 = vsub.f32 %v4478_v6, %v2150_v46  ;;  %v2194_v9 = vsub.f32 %v4475_v26, %v2150_v46  ;;  %v2195_v32 = vsub.f32 %v4481_v52, %v2150_v46  ;;  %v2196_v23 = vsub.f32 %v4495_v14, %v2150_v46 }
 0x75d   :  { %v2190_v22 = vsub.f32 %v2188_v56, %v2189_v43  ;;  %v2197_v2 = vsub.f32 %v4505_v57, %v2150_v46  ;;  %v2198_v60 = vsub.f32 %v4499_v16, %v2150_v46  ;;  %v2199_v44 = vsub.f32 %v4508_v45, %v2150_v46  ;;  %v2561_v16 = vld [vmem:[%s4677_s10 + $0x1] ss:$0 sm:$0xff] }
 0x75e   :  { %v2200_v0 = vsub.f32 %v4519_v51, %v2150_v46  ;;  %v2201_v12 = vsub.f32 %v4529_v25, %v2150_v46  ;;  %v2202_v6 = vsub.f32 %v4523_v34, %v2150_v46  ;;  %v2203_v26 = vsub.f32 %v4532_v55, %v2150_v46 }
 0x75f   :  { %v2191_v31 = vmax.f32 %v2190_v22, 0.0  ;;  %v2204_v52 = vsub.f32 %v4543_v4, %v2150_v46  ;;  %v2206_v14 = vsub.f32 %v4547_v5, %v2150_v46  ;;  %v2207_v57 = vsub.f32 %v4554_v13, %v2150_v46  ;;  %v4585_v5 = vld [vmem:[%s4678_s11 + $0x1] ss:$0 sm:$0xff] }
 0x760   :  { %v2227_v45 = vmul.f32 %v2561_v16, %v2205_v41  ;;  %v2214_v51 = vmul.f32 %v2561_v16, %v2192_v24  ;;  %v2215_v40 = vmul.f32 %v2561_v16, %v2193_v21  ;;  %v2216_v25 = vmul.f32 %v2561_v16, %v2194_v9 }
 0x761   :  { %v2230_v63 = vadd.f32 1e-05, %v2191_v31  ;;  %v2217_v10 = vmul.f32 %v2561_v16, %v2195_v32  ;;  %v2218_v34 = vmul.f32 %v2561_v16, %v2196_v23  ;;  %v2219_v3 = vmul.f32 %v2561_v16, %v2197_v2 }
 0x762   :  { %v2220_v55 = vmul.f32 %v2561_v16, %v2198_v60  ;;  %v2221_v50 = vmul.f32 %v2561_v16, %v2199_v44  ;;  %v2222_v47 = vmul.f32 %v2561_v16, %v2200_v0  ;;  %v2223_v4 = vmul.f32 %v2561_v16, %v2201_v12 }
 0x763   :  { %3427 = vrsqrt.f32 %v2230_v63  ;;  %v2224_v20 = vmul.f32 %v2561_v16, %v2202_v6  ;;  %v2225_v13 = vmul.f32 %v2561_v16, %v2203_v26  ;;  %v2226_v29 = vmul.f32 %v2561_v16, %v2204_v52 }
 0x764   :  { %v2228_v27 = vmul.f32 %v2561_v16, %v2206_v14  ;;  %v4587_v8 = vmul.f32 %v2561_v16, %v2207_v57 }
 0x76d   :  { %v4580_v53 = vpop.eup %3427 }
 0x76e   :  { %v2245_v58 = vmul.f32 %v4580_v53, %v2227_v45  ;;  %v2232_v7 = vmul.f32 %v4580_v53, %v2214_v51  ;;  %v2233_v17 = vmul.f32 %v4580_v53, %v2215_v40  ;;  %v2234_v19 = vmul.f32 %v4580_v53, %v2216_v25 }
 0x76f   :  { %v2235_v46 = vmul.f32 %v4580_v53, %v2217_v10  ;;  %v2236_v59 = vmul.f32 %v4580_v53, %v2218_v34  ;;  %v2237_v56 = vmul.f32 %v4580_v53, %v2219_v3  ;;  %v2238_v43 = vmul.f32 %v4580_v53, %v2220_v55 }
 0x770   :  { %v2254_v41 = vadd.f32 %v4585_v5, %v2232_v7  ;;  %v2255_v24 = vadd.f32 %v4585_v5, %v2233_v17  ;;  %v2256_v21 = vadd.f32 %v4585_v5, %v2234_v19  ;;  %v2239_v9 = vmul.f32 %v4580_v53, %v2221_v50 }
 0x771   :  { %v2257_v32 = vadd.f32 %v4585_v5, %v2235_v46  ;;  %v2258_v23 = vadd.f32 %v4585_v5, %v2236_v59  ;;  %v2259_v22 = vadd.f32 %v4585_v5, %v2237_v56  ;;  %v2260_v2 = vadd.f32 %v4585_v5, %v2238_v43 }
 0x772   :  { %v2270_v31 = vmul.f32 %v2254_v41, %v3616_v35  ;;  %v2271_v60 = vmul.f32 %v2255_v24, %v3620_v37  ;;  %v2272_v44 = vmul.f32 %v2256_v21, %v3618_v36  ;;  %v2261_v0 = vadd.f32 %v4585_v5, %v2239_v9 }
 0x773   :  { %v2273_v12 = vmul.f32 %v2257_v32, %v3622_v38  ;;  %v2274_v6 = vmul.f32 %v2258_v23, %v3624_v39  ;;  %v2275_v26 = vmul.f32 %v2259_v22, %v3631_v42  ;;  %v4613_v63 = vmul.f32 %v2260_v2, %v3636_v49 }
 0x774   :  { %v3310_v52 = vpack.c.bf16 %v2271_v60, %v2270_v31  ;;  %v2356_v14 = vmul.f32 %v2270_v31, %v2270_v31  ;;  %v2357_v57 = vmul.f32 %v2271_v60, %v2271_v60  ;;  %v2358_v16 = vmul.f32 %v2272_v44, %v2272_v44 }
 0x775   :  { %v3313_v35 = vpack.c.bf16 %v2273_v12, %v2272_v44  ;;  %v2359_v45 = vmul.f32 %v2273_v12, %v2273_v12  ;;  %v3316_v37 = vpack.c.bf16 %v2275_v26, %v2274_v6  ;;  %v2360_v51 = vmul.f32 %v2274_v6, %v2274_v6 }
 0x776   :  { %3311 = vmatpush3.bf16.msra.mxu1 %v3310_v52  ;;  %v3334_v36 = vpack.c.bf16 %v2357_v57, %v2356_v14  ;;  %v2361_v40 = vmul.f32 %v2275_v26, %v2275_v26  ;;  %v2277_v38 = vmul.f32 %v2261_v0, %v3648_v54  ;;  %v2362_v39 = vmul.f32 %v4613_v63, %v4613_v63 }
 0x777   :  { %3312 = vmatprep.subr.bf16.mxu1 %v3441_v33  ;;  %v3337_v42 = vpack.c.bf16 %v2359_v45, %v2358_v16  ;;  %v2240_v49 = vmul.f32 %v4580_v53, %v2222_v47  ;;  %v2241_v25 = vmul.f32 %v4580_v53, %v2223_v4  ;;  %v2242_v10 = vmul.f32 %v4580_v53, %v2224_v20 }
 0x778   :  { %3335 = vmatpush3.bf16.msra.mxu0 %v3334_v36  ;;  %v3340_v34 = vpack.c.bf16 %v2361_v40, %v2360_v51  ;;  %v3319_v3 = vpack.c.bf16 %v2277_v38, %v4613_v63  ;;  %v2363_v55 = vmul.f32 %v2277_v38, %v2277_v38  ;;  %v2243_v50 = vmul.f32 %v4580_v53, %v2225_v13 }
 0x779   :  { %3336 = vmatprep.subr.bf16.mxu0 %v3441_v33  ;;  %v2262_v54 = vadd.f32 %v4585_v5, %v2240_v49  ;;  %v2263_v7 = vadd.f32 %v4585_v5, %v2241_v25  ;;  %v2264_v17 = vadd.f32 %v4585_v5, %v2242_v10  ;;  %v2244_v47 = vmul.f32 %v4580_v53, %v2226_v29 }
 0x77a   :  { %3314 = vmatpush3.bf16.msra.mxu1 %v3313_v35  ;;  %v3343_v4 = vpack.c.bf16 %v2363_v55, %v2362_v39  ;;  %v2265_v20 = vadd.f32 %v4585_v5, %v2243_v50  ;;  %v2267_v19 = vadd.f32 %v4585_v5, %v2245_v58  ;;  %v2246_v46 = vmul.f32 %v4580_v53, %v2228_v27 }
 0x77b   :  { %3315 = vmatprep.subr.bf16.mxu1 %v3441_v33  ;;  %v2278_v13 = vmul.f32 %v2262_v54, %v3660_v62  ;;  %v2279_v59 = vmul.f32 %v2263_v7, %v3674_v11  ;;  %v2280_v56 = vmul.f32 %v2264_v17, %v3688_v18  ;;  %v2266_v43 = vadd.f32 %v4585_v5, %v2244_v47 }
 0x77c   :  { %3338 = vmatpush3.bf16.msra.mxu0 %v3337_v42  ;;  %v2281_v29 = vmul.f32 %v2265_v20, %v3698_v30  ;;  %v2283_v41 = vmul.f32 %v2267_v19, %v3725_v1  ;;  %v2247_v58 = vmul.f32 %v4580_v53, %v4587_v8  ;;  %v2268_v27 = vadd.f32 %v4585_v5, %v2246_v46 }
 0x77d   :  { %3339 = vmatprep.subr.bf16.mxu0 %v3441_v33  ;;  %v3322_v24 = vpack.c.bf16 %v2279_v59, %v2278_v13  ;;  %v2364_v62 = vmul.f32 %v2278_v13, %v2278_v13  ;;  %v2365_v21 = vmul.f32 %v2279_v59, %v2279_v59  ;;  %v2366_v11 = vmul.f32 %v2280_v56, %v2280_v56 }
 0x77e   :  { %3317 = vmatpush3.bf16.msra.mxu1 %v3316_v37  ;;  %v3325_v18 = vpack.c.bf16 %v2281_v29, %v2280_v56  ;;  %v2367_v9 = vmul.f32 %v2281_v29, %v2281_v29  ;;  %v2282_v32 = vmul.f32 %v2266_v43, %v3711_v48  ;;  %v2369_v23 = vmul.f32 %v2283_v41, %v2283_v41 }
 0x77f   :  { %3318 = vmatprep.subr.bf16.mxu1 %v3441_v33  ;;  %v3346_v30 = vpack.c.bf16 %v2365_v21, %v2364_v62  ;;  %v2269_v1 = vadd.f32 %v4585_v5, %v2247_v58  ;;  %v2284_v53 = vmul.f32 %v2268_v27, %v3735_v15 }
 0x780   :  { %3341 = vmatpush3.bf16.msra.mxu0 %v3340_v34  ;;  %v3349_v8 = vpack.c.bf16 %v2367_v9, %v2366_v11  ;;  %v3328_v22 = vpack.c.bf16 %v2283_v41, %v2282_v32  ;;  %v2368_v2 = vmul.f32 %v2282_v32, %v2282_v32 }
 0x781   :  { %3342 = vmatprep.subr.bf16.mxu0 %v3441_v33  ;;  %v2285_v31 = vmul.f32 %v2269_v1, %v3749_v28  ;;  %v2370_v60 = vmul.f32 %v2284_v53, %v2284_v53 }
 0x782   :  { %3320 = vmatpush3.bf16.msra.mxu1 %v3319_v3  ;;  %v3352_v44 = vpack.c.bf16 %v2369_v23, %v2368_v2 }
 0x783   :  { %3321 = vmatprep.subr.bf16.mxu1 %v3441_v33  ;;  %v3331_v48 = vpack.c.bf16 %v2285_v31, %v2284_v53  ;;  %v2371_v0 = vmul.f32 %v2285_v31, %v2285_v31 }
 0x784   :  { %3344 = vmatpush3.bf16.msra.mxu0 %v3343_v4 }
 0x785   :  { %3345 = vmatprep.subr.bf16.mxu0 %v3441_v33  ;;  %v3355_v5 = vpack.c.bf16 %v2371_v0, %v2370_v60 }
 0x786   :  { %3323 = vmatpush3.bf16.msra.mxu1 %v3322_v24 }
 0x787   :  { %3324 = vmatprep.subr.bf16.mxu1 %v3441_v33 }
 0x788   :  { %3347 = vmatpush3.bf16.msra.mxu0 %v3346_v30 }
 0x789   :  { %3348 = vmatprep.subr.bf16.mxu0 %v3441_v33 }
 0x78a   :  { %3326 = vmatpush3.bf16.msra.mxu1 %v3325_v18 }
 0x78b   :  { %3327 = vmatprep.subr.bf16.mxu1 %v3441_v33 }
 0x78c   :  { %3350 = vmatpush3.bf16.msra.mxu0 %v3349_v8 }
 0x78d   :  { %3351 = vmatprep.subr.bf16.mxu0 %v3441_v33 }
 0x78e   :  { %3329 = vmatpush3.bf16.msra.mxu1 %v3328_v22 }
 0x78f   :  { %3330 = vmatprep.subr.bf16.mxu1 %v3441_v33 }
 0x790   :  { %3353 = vmatpush3.bf16.msra.mxu0 %v3352_v44 }
 0x791   :  { %3354 = vmatprep.subr.bf16.mxu0 %v3441_v33 }
 0x792   :  { %3332 = vmatpush3.bf16.msra.mxu1 %v3331_v48 }
 0x794   :  { %3356 = vmatpush3.bf16.msra.mxu0 %v3355_v5 }
 0x795   :  { %3176 = vmatmul.mubr.f32.vlgmr.msra.gmra.mrb[52].mxu1 %v4362_v61 }
 0x797   :  { %3211 = vmatmul.mubr.f32.vlgmr.msra.gmra.mrb[68].mxu0 %v4362_v61 }
 0x868   :  { %v2352_v15 = vpop.f32.mrb[52].mxu1 }
 0x869   :  { %v2442_v28 = vmul.f32 %v2352_v15, %v2352_v15  ;;  %2564 = vst [vmem:[%s4675_s12 + $0x10] sm:$0xff] %v2352_v15  ;;  %v3177_v12 = vpop.f32.mrb[53].mxu1 }
 0x86a   :  { %v2438_v6 = vpop.f32.mrb[68].mxu0 }
 0x86b   :  { %v2443_v26 = vsub.f32 %v2438_v6, %v2442_v28  ;;  %v3212_v63 = vpop.f32.mrb[69].mxu0 }
 0x86d   :  { %v2444_v52 = vmax.f32 %v2443_v26, 0.0 }
 0x86f   :  { %3429 = vrsqrt.f32 %v2444_v52  ;;  %vm2447_vm5 = vcmp.eq.f32.partialorder %v2444_v52, inf  ;;  %v2450_v57 = vand.u32 2147483648, %v2444_v52  ;;  %vm2449_vm6 = vcmp.eq.f32.partialorder %v2444_v52, 0.0 }
 0x879   :  { %v3430_v14 = vpop.eup %3429 }
 0x87a   :  { %v2446_v33 = vmul.f32 %v3430_v14, %v2444_v52 }
 0x87c   :  { %v2448_v16 = vsel %vm2447_vm5, %v2444_v52, %v2446_v33 }
 0x87d   :  { %v2451_v35 = vsel %vm2449_vm6, %v2450_v57, %v2448_v16 }
 0x87e   :  { %2563 = vst [vmem:[%s4676_s13 + $0x10] sm:$0xff] %v2451_v35 }

</bundles_post_ra>
